<compile_context>
chip_gen: v7x
topology: tpu7x:2x2x1
jax: 0.10.0
libtpu: 0.0.40
codegen_flags: <defaults>
</compile_context>

<pallas_src>
import jax
import jax.numpy as jnp
from jax.experimental import pallas as pl
from jax.experimental.pallas import tpu as pltpu

# ----------------------------- small, consistent config -----------------------------
B       = 2               # batch
nD      = 8               # x.shape[1]  (GRU sequence length T)
C2      = 2               # x.shape[2]
N_IN    = nD * C2         # n_input_channel (= 16) ; also #grid points (required by head Linear)
DIM_X   = 2               # trunk input dim
D_HID   = 32              # deeponet hidden size (deeponet_num_layers = 3 -> 2 linears/net)
G_HID   = 32              # gru hidden size
N_OUT   = 3 * nD          # n_output_channel (= 24) -> reshape to (B, nD, 3)
GRU_IN  = 3               # GRU input size
T       = nD
HEAD_H  = 4 * N_OUT       # 96 (head hidden width)
STEP_W  = 3 * G_HID       # 96 (per-step [r|z|n] gate block)
OUT_PAD = 128             # lane-dense padded output width

VMEM = pl.BlockSpec(memory_space=pltpu.MemorySpace.VMEM)
F32 = jnp.float32


# ----------------------------- host-side parameter packing -----------------------------
def pack_rows(named_blocks, align=8):
    """Stack same-width 2-D blocks along rows (each block row-padded to `align`).
    Returns (slab, offsets, rows) so the kernel can slice with static offsets."""
    width = named_blocks[0][1].shape[1]
    parts, off, rows, r = [], {}, {}, 0
    for name, a in named_blocks:
        assert a.ndim == 2 and a.shape[1] == width, (name, a.shape)
        off[name], rows[name] = r, a.shape[0]
        pad = (-a.shape[0]) % align
        ap = jnp.concatenate([a, jnp.zeros((pad, width), a.dtype)], axis=0) if pad else a
        parts.append(ap)
        r += ap.shape[0]
    return jnp.concatenate(parts, axis=0), off, rows


def pack_params(don_params, gru_params, grid_pts):
    (bw0, bb0, bw1, bb1, tw0, tb0, tw1, tb1, don_b, ow0, ob0, ow1, ob1) = don_params
    (wih0, whh0, bih0, bhh0, wih1, whh1, bih1, bhh1, lw, lb) = gru_params
    H = G_HID

    # grid is a constant module buffer -> precompute trunk features once (host side).
    t = jnp.maximum(grid_pts @ tw0 + tb0, 0.0)
    tpre = jnp.maximum(t @ tw1 + tb1, 0.0)                         # (N_IN, D_HID)

    # ---- fold branch-last-linear ∘ trunk-product ∘ head-first-linear into ONE matmul ----
    #   hh = relu( relu(x @ bw0 + bb0) @ W1 + b1_head )
    TtO = tpre.T @ ow0                                             # (D_HID, HEAD_H)
    W1 = bw1 @ TtO                                                 # (D_HID, HEAD_H)
    b1_head = ob0 + bb1 @ TtO + don_b[0, 0] * jnp.sum(ow0, axis=0, keepdims=True)

    def gate(w, g):  # packed (in, 3H) [r|z|n] -> (in, H)
        return w[:, g * H:(g + 1) * H]

    # ---- GRU layer-0 i2h hoisted over ALL steps, head-second-linear (ow1, ob1) folded in ----
    # column block of step t: [r(32) | z(32) | n(32)] at cols STEP_W*t .. STEP_W*(t+1)
    #   gi0[b, col] = hh[b] @ (ow1[:, 3t:3t+3] @ wih0_g) + ob1[:, 3t:3t+3] @ wih0_g + bias_g
    W_gi0 = jnp.zeros((HEAD_H, T * STEP_W), F32)
    b_gi0 = jnp.zeros((1, T * STEP_W), F32)
    for tt in range(T):
        for g in range(3):
            wg = gate(wih0, g)                                     # (3, H)
            col = STEP_W * tt + g * H
            W_gi0 = W_gi0.at[:, col:col + H].set(ow1[:, 3 * tt:3 * tt + 3] @ wg)
            bias = gate(bih0, g) + (gate(bhh0, g) if g < 2 else 0.0)  # b_hn stays in r-term
            b_gi0 = b_gi0.at[:, col:col + H].set(ob1[:, 3 * tt:3 * tt + 3] @ wg + bias)

    # layer-1 i2h bias: r/z fold bih+bhh; n keeps only bih (b_hn stays in the r-multiplied term)
    b1i = jnp.concatenate([bih1[:, :2 * H] + bhh1[:, :2 * H], bih1[:, 2 * H:]], axis=1)

    # ---- final Linear(gru_hidden, 3) as block-placed rows of a lane-dense (T*H, 128) matrix ----
    # out[:, 3t:3t+3] = h1_t @ lw + lb  ->  out_acc += h1_t @ lwb[H*t:H*(t+1), :]
    lwb = jnp.zeros((T * H, OUT_PAD), F32)
    lbp = jnp.zeros((1, OUT_PAD), F32)
    for tt in range(T):
        lwb = lwb.at[H * tt:H * (tt + 1), 3 * tt:3 * tt + 3].set(lw)
        lbp = lbp.at[:, 3 * tt:3 * tt + 3].set(lb)

    wA, offA, rowsA = pack_rows([("bw0", bw0), ("bb0", bb0),
                                 ("bhh0_n", gate(bhh0, 2)), ("bhh1_n", gate(bhh1, 2))])
    wB, offB, rowsB = pack_rows([("W1", W1), ("b1_head", b1_head),
                                 ("whh0", whh0), ("wih1", wih1), ("whh1", whh1), ("b1i", b1i)])
    wC, offC, rowsC = pack_rows([("W_gi0", W_gi0), ("b_gi0", b_gi0)])
    wD, offD, rowsD = pack_rows([("lwb", lwb), ("lbp", lbp)])

    slabs = {"wA": wA, "wB": wB, "wC": wC, "wD": wD}
    layout = {"wA": (offA, rowsA), "wB": (offB, rowsB),
              "wC": (offC, rowsC), "wD": (offD, rowsD)}
    return slabs, layout


# ----------------------------- fused kernel -----------------------------
def make_fused_kernel(layout):
    offA, rowsA = layout["wA"]
    offB, rowsB = layout["wB"]
    offC, rowsC = layout["wC"]
    offD, rowsD = layout["wD"]
    H = G_HID

    def kernel(x_ref, wa_ref, wb_ref, wc_ref, wd_ref, out_ref):
        def gA(n):
            o = offA[n]; return wa_ref[o:o + rowsA[n], :]
        def gB(n):
            o = offB[n]; return wb_ref[o:o + rowsB[n], :]
        def gC(n):
            o = offC[n]; return wc_ref[o:o + rowsC[n], :]

        def sig(v):  # sigmoid as a single EUP tanh push
            return 0.5 * jnp.tanh(0.5 * v) + 0.5

        # ---------------- branch FNN + (pack-time folded) trunk product + head layer 1 ----------------
        x = x_ref[...]                                                       # (B, N_IN)
        hb = jnp.maximum(jnp.dot(x, gA("bw0"), preferred_element_type=F32) + gA("bb0"), 0.0)
        hh = jnp.maximum(jnp.dot(hb, gB("W1"), preferred_element_type=F32) + gB("b1_head"), 0.0)

        # ---------------- GRU layer-0 i2h for ALL steps (head layer 2 folded): ONE matmul ----------------
        gi0 = jnp.dot(hh, gC("W_gi0"), preferred_element_type=F32) + gC("b_gi0")    # (B, T*STEP_W)

        whh0, wih1, whh1 = gB("whh0"), gB("wih1"), gB("whh1")                # each (H, 3H) [r|z|n]
        b1i = gB("b1i")                                                      # (1, 3H)
        bn0, bn1 = gA("bhh0_n"), gA("bhh1_n")                                # (1, H)

        def cell(h, gi, whh, bhn):
            # PyTorch GRU step; gi = x_t@W_ih + biases ([r|z|n], r/z biases fully folded,
            # n only i-side: b_hn must stay inside the r-multiplied term).
            gh = jnp.dot(h, whh, preferred_element_type=F32)                 # (B, 3H), 1 matmul
            rz = sig(gi[:, :2 * H] + gh[:, :2 * H])                          # combined r|z sigmoid
            r, z = rz[:, :H], rz[:, H:2 * H]
            n = jnp.tanh(gi[:, 2 * H:] + r * (gh[:, 2 * H:] + bhn))
            return (1.0 - z) * n + z * h

        def cell0(gi, bhn):              # peeled first step: h == 0 -> no hidden matmul
            rz = sig(gi[:, :2 * H])
            r, z = rz[:, :H], rz[:, H:2 * H]
            n = jnp.tanh(gi[:, 2 * H:] + r * bhn)
            return (1.0 - z) * n

        # ---------------- fused 2-layer recurrence, fully unrolled (T = 8) ----------------
        lwb_off = offD["lwb"]
        out_acc = jnp.zeros((B, OUT_PAD), F32)
        h0 = h1 = None
        for t in range(T):
            g0 = gi0[:, STEP_W * t:STEP_W * (t + 1)]                         # (B, 3H) for step t
            h0 = cell0(g0, bn0) if t == 0 else cell(h0, g0, whh0, bn0)
            g1 = jnp.dot(h0, wih1, preferred_element_type=F32) + b1i         # layer-1 i2h, 1 matmul
            h1 = cell0(g1, bn1) if t == 0 else cell(h1, g1, whh1, bn1)
            # per-step output contribution (off the recurrent chain; MXU otherwise idle)
            out_acc = out_acc + jnp.dot(
                h1, wd_ref[lwb_off + H * t:lwb_off + H * (t + 1), :],
                preferred_element_type=F32)

        # lane-dense (B, 128) store; wrapper strips the pad columns
        out_ref[...] = out_acc + wd_ref[offD["lbp"]:offD["lbp"] + rowsD["lbp"], :]

    return kernel


def build_forward(layout):
    kernel = make_fused_kernel(layout)
    pcall = pl.pallas_call(
        kernel,
        out_shape=jax.ShapeDtypeStruct((B, OUT_PAD), F32),
        in_specs=[VMEM] * 5,
        out_specs=VMEM,
        compiler_params=pltpu.CompilerParams(vmem_limit_bytes=4 * 1024 * 1024),
    )

    @jax.jit
    def forward(x, slabs):
        out2d = pcall(x.reshape(B, N_IN),
                      slabs["wA"], slabs["wB"], slabs["wC"], slabs["wD"])
        return out2d[:, :N_OUT].reshape(B, nD, GRU_IN)

    return forward


# ----------------------------- pure-JAX reference (for validation) -----------------------------
def reference(x, grid_pts, don_params, gru_params):
    (bw0, bb0, bw1, bb1, tw0, tb0, tw1, tb1, don_b, ow0, ob0, ow1, ob1) = don_params
    (wih0, whh0, bih0, bhh0, wih1, whh1, bih1, bhh1, lw, lb) = gru_params
    xf = x.reshape(B, N_IN)
    h = jnp.maximum(xf @ bw0 + bb0, 0.0)
    h = h @ bw1 + bb1
    t = jnp.maximum(grid_pts @ tw0 + tb0, 0.0)
    t = jnp.maximum(t @ tw1 + tb1, 0.0)
    y = h @ t.T + don_b[0, 0]
    y = jnp.maximum(y @ ow0 + ob0, 0.0)
    y = y @ ow1 + ob1
    seq = y.reshape(B, nD, GRU_IN)
    H = G_HID
    for (wih, whh, bih, bhh) in ((wih0, whh0, bih0, bhh0), (wih1, whh1, bih1, bhh1)):
        hh = jnp.zeros((B, H), F32)
        outs = []
        for ti in range(nD):
            xt = seq[:, ti, :]
            gi = xt @ wih + bih
            gh = hh @ whh + bhh
            r = jax.nn.sigmoid(gi[:, :H] + gh[:, :H])
            z = jax.nn.sigmoid(gi[:, H:2 * H] + gh[:, H:2 * H])
            n = jnp.tanh(gi[:, 2 * H:] + r * gh[:, 2 * H:])
            hh = (1.0 - z) * n + z * hh
            outs.append(hh)
        seq = jnp.stack(outs, axis=1)
    return seq @ lw + lb


# ----------------------------- deterministic parameter construction -----------------------------
def glorot(key, shape):
    fan_in, fan_out = shape
    std = (2.0 / (fan_in + fan_out)) ** 0.5
    return (std * jax.random.normal(key, shape, F32)).astype(F32)


def make_params(key):
    ks = jax.random.split(key, 24)
    bw0 = glorot(ks[0], (N_IN, D_HID));  bb0 = jnp.zeros((1, D_HID), F32)
    bw1 = glorot(ks[1], (D_HID, D_HID)); bb1 = jnp.zeros((1, D_HID), F32)
    tw0 = glorot(ks[2], (DIM_X, D_HID)); tb0 = jnp.zeros((1, D_HID), F32)
    tw1 = glorot(ks[3], (D_HID, D_HID)); tb1 = jnp.zeros((1, D_HID), F32)
    don_b = jnp.zeros((1, 1), F32)
    ow0 = glorot(ks[4], (N_IN, 4 * N_OUT));   ob0 = 0.01 * jax.random.normal(ks[5], (1, 4 * N_OUT), F32)
    ow1 = glorot(ks[6], (4 * N_OUT, N_OUT));  ob1 = 0.01 * jax.random.normal(ks[7], (1, N_OUT), F32)
    don_params = (bw0, bb0, bw1, bb1, tw0, tb0, tw1, tb1, don_b, ow0, ob0, ow1, ob1)
    # GRU (weights stored as (in, 3H); gate packing order [r|z|n] like PyTorch)
    s = 1.0 / (G_HID ** 0.5)
    wih0 = s * jax.random.normal(ks[8], (GRU_IN, 3 * G_HID), F32)
    whh0 = s * jax.random.normal(ks[9], (G_HID, 3 * G_HID), F32)
    bih0 = s * jax.random.normal(ks[10], (1, 3 * G_HID), F32)
    bhh0 = s * jax.random.normal(ks[11], (1, 3 * G_HID), F32)
    wih1 = s * jax.random.normal(ks[12], (G_HID, 3 * G_HID), F32)
    whh1 = s * jax.random.normal(ks[13], (G_HID, 3 * G_HID), F32)
    bih1 = s * jax.random.normal(ks[14], (1, 3 * G_HID), F32)
    bhh1 = s * jax.random.normal(ks[15], (1, 3 * G_HID), F32)
    lw = s * jax.random.normal(ks[16], (G_HID, 3), F32)
    lb = s * jax.random.normal(ks[17], (1, 3), F32)
    gru_params = (wih0, whh0, bih0, bhh0, wih1, whh1, bih1, bhh1, lw, lb)
    return don_params, gru_params


if __name__ == "__main__":
    key = jax.random.PRNGKey(0)
    kp, kx, kg = jax.random.split(key, 3)
    don_params, gru_params = make_params(kp)

    x = jax.random.normal(kx, (B, nD, C2), F32)            # module input
    grid_pts = jax.random.normal(kg, (N_IN, DIM_X), F32)   # trunk "grid" (constant module buffer)

    slabs, layout = pack_params(don_params, gru_params, grid_pts)
    forward = build_forward(layout)

    out = jax.block_until_ready(forward(x, slabs))

    ref = reference(x, grid_pts, don_params, gru_params)
    assert out.shape == (B, nD, 3), out.shape
    err = float(jnp.max(jnp.abs(out - ref)))
    assert err < 5e-4, err
    print("KERNEL_OK")
</pallas_src>

<mosaic_0001>
module attributes {stable_mosaic.version = 11 : i64} {
  func.func @kernel(%arg0: memref<2x16xf32, #tpu.memory_space<vmem>>, %arg1: memref<40x32xf32, #tpu.memory_space<vmem>>, %arg2: memref<144x96xf32, #tpu.memory_space<vmem>>, %arg3: memref<104x768xf32, #tpu.memory_space<vmem>>, %arg4: memref<264x128xf32, #tpu.memory_space<vmem>>, %arg5: memref<2x128xf32, #tpu.memory_space<vmem>>) attributes {dimension_semantics = [], scalar_prefetch = 0 : i64, scratch_operands = 0 : i64, tpu.core_type = #tpu.core_type<tc>} {
    %c0 = arith.constant 0 : index
    %c0_0 = arith.constant 0 : index
    %0 = vector.load %arg0[%c0, %c0_0] : memref<2x16xf32, #tpu.memory_space<vmem>>, vector<2x16xf32>
    %c0_1 = arith.constant 0 : index
    %c0_2 = arith.constant 0 : index
    %1 = vector.load %arg1[%c0_1, %c0_2] : memref<40x32xf32, #tpu.memory_space<vmem>>, vector<16x32xf32>
    %cst = arith.constant dense<0.000000e+00> : vector<2x32xf32>
    %2 = tpu.matmul %0, %1, %cst {dimension_numbers = #tpu.dot_dimension_numbers<[1], [0], [0], [1], [0, 0, 1, 1], [], []>} : vector<2x16xf32>, vector<16x32xf32>, vector<2x32xf32> -> vector<2x32xf32>
    %c16 = arith.constant 16 : index
    %c0_3 = arith.constant 0 : index
    %3 = vector.load %arg1[%c16, %c0_3] : memref<40x32xf32, #tpu.memory_space<vmem>>, vector<1x32xf32>
    %4 = vector.broadcast %3 : vector<1x32xf32> to vector<2x32xf32>
    %5 = arith.addf %2, %4 : vector<2x32xf32>
    %cst_4 = arith.constant 0.000000e+00 : f32
    %6 = vector.broadcast %cst_4 : f32 to vector<2x32xf32>
    %7 = arith.maximumf %5, %6 : vector<2x32xf32>
    %c0_5 = arith.constant 0 : index
    %c0_6 = arith.constant 0 : index
    %8 = vector.load %arg2[%c0_5, %c0_6] : memref<144x96xf32, #tpu.memory_space<vmem>>, vector<32x96xf32>
    %cst_7 = arith.constant dense<0.000000e+00> : vector<2x96xf32>
    %9 = tpu.matmul %7, %8, %cst_7 {dimension_numbers = #tpu.dot_dimension_numbers<[1], [0], [0], [1], [0, 0, 1, 1], [], []>} : vector<2x32xf32>, vector<32x96xf32>, vector<2x96xf32> -> vector<2x96xf32>
    %c32 = arith.constant 32 : index
    %c0_8 = arith.constant 0 : index
    %10 = vector.load %arg2[%c32, %c0_8] : memref<144x96xf32, #tpu.memory_space<vmem>>, vector<1x96xf32>
    %11 = vector.broadcast %10 : vector<1x96xf32> to vector<2x96xf32>
    %12 = arith.addf %9, %11 : vector<2x96xf32>
    %cst_9 = arith.constant 0.000000e+00 : f32
    %13 = vector.broadcast %cst_9 : f32 to vector<2x96xf32>
    %14 = arith.maximumf %12, %13 : vector<2x96xf32>
    %c0_10 = arith.constant 0 : index
    %c0_11 = arith.constant 0 : index
    %15 = vector.load %arg3[%c0_10, %c0_11] : memref<104x768xf32, #tpu.memory_space<vmem>>, vector<96x768xf32>
    %cst_12 = arith.constant dense<0.000000e+00> : vector<2x768xf32>
    %16 = tpu.matmul %14, %15, %cst_12 {dimension_numbers = #tpu.dot_dimension_numbers<[1], [0], [0], [1], [0, 0, 1, 1], [], []>} : vector<2x96xf32>, vector<96x768xf32>, vector<2x768xf32> -> vector<2x768xf32>
    %c96 = arith.constant 96 : index
    %c0_13 = arith.constant 0 : index
    %17 = vector.load %arg3[%c96, %c0_13] : memref<104x768xf32, #tpu.memory_space<vmem>>, vector<1x768xf32>
    %18 = vector.broadcast %17 : vector<1x768xf32> to vector<2x768xf32>
    %19 = arith.addf %16, %18 : vector<2x768xf32>
    %c40 = arith.constant 40 : index
    %c0_14 = arith.constant 0 : index
    %20 = vector.load %arg2[%c40, %c0_14] : memref<144x96xf32, #tpu.memory_space<vmem>>, vector<32x96xf32>
    %c72 = arith.constant 72 : index
    %c0_15 = arith.constant 0 : index
    %21 = vector.load %arg2[%c72, %c0_15] : memref<144x96xf32, #tpu.memory_space<vmem>>, vector<32x96xf32>
    %c104 = arith.constant 104 : index
    %c0_16 = arith.constant 0 : index
    %22 = vector.load %arg2[%c104, %c0_16] : memref<144x96xf32, #tpu.memory_space<vmem>>, vector<32x96xf32>
    %c136 = arith.constant 136 : index
    %c0_17 = arith.constant 0 : index
    %23 = vector.load %arg2[%c136, %c0_17] : memref<144x96xf32, #tpu.memory_space<vmem>>, vector<1x96xf32>
    %c24 = arith.constant 24 : index
    %c0_18 = arith.constant 0 : index
    %24 = vector.load %arg1[%c24, %c0_18] : memref<40x32xf32, #tpu.memory_space<vmem>>, vector<1x32xf32>
    %c32_19 = arith.constant 32 : index
    %c0_20 = arith.constant 0 : index
    %25 = vector.load %arg1[%c32_19, %c0_20] : memref<40x32xf32, #tpu.memory_space<vmem>>, vector<1x32xf32>
    %cst_21 = arith.constant 0.000000e+00 : f32
    %26 = vector.broadcast %cst_21 : f32 to vector<2x128xf32>
    %27 = vector.extract_strided_slice %19 {offsets = [0, 0], sizes = [2, 96], strides = [1, 1]} : vector<2x768xf32> to vector<2x96xf32>
    %28 = vector.extract_strided_slice %27 {offsets = [0, 0], sizes = [2, 64], strides = [1, 1]} : vector<2x96xf32> to vector<2x64xf32>
    %cst_22 = arith.constant 5.000000e-01 : f32
    %29 = vector.broadcast %cst_22 : f32 to vector<2x64xf32>
    %30 = arith.mulf %29, %28 : vector<2x64xf32>
    %31 = math.tanh %30 : vector<2x64xf32>
    %cst_23 = arith.constant 5.000000e-01 : f32
    %32 = vector.broadcast %cst_23 : f32 to vector<2x64xf32>
    %33 = arith.mulf %32, %31 : vector<2x64xf32>
    %cst_24 = arith.constant 5.000000e-01 : f32
    %34 = vector.broadcast %cst_24 : f32 to vector<2x64xf32>
    %35 = arith.addf %33, %34 : vector<2x64xf32>
    %36 = vector.extract_strided_slice %35 {offsets = [0, 0], sizes = [2, 32], strides = [1, 1]} : vector<2x64xf32> to vector<2x32xf32>
    %37 = vector.extract_strided_slice %35 {offsets = [0, 32], sizes = [2, 32], strides = [1, 1]} : vector<2x64xf32> to vector<2x32xf32>
    %38 = vector.extract_strided_slice %27 {offsets = [0, 64], sizes = [2, 32], strides = [1, 1]} : vector<2x96xf32> to vector<2x32xf32>
    %39 = vector.broadcast %24 : vector<1x32xf32> to vector<2x32xf32>
    %40 = arith.mulf %36, %39 : vector<2x32xf32>
    %41 = arith.addf %38, %40 : vector<2x32xf32>
    %42 = math.tanh %41 : vector<2x32xf32>
    %cst_25 = arith.constant 1.000000e+00 : f32
    %43 = vector.broadcast %cst_25 : f32 to vector<2x32xf32>
    %44 = arith.subf %43, %37 : vector<2x32xf32>
    %45 = arith.mulf %44, %42 : vector<2x32xf32>
    %cst_26 = arith.constant dense<0.000000e+00> : vector<2x96xf32>
    %46 = tpu.matmul %45, %21, %cst_26 {dimension_numbers = #tpu.dot_dimension_numbers<[1], [0], [0], [1], [0, 0, 1, 1], [], []>} : vector<2x32xf32>, vector<32x96xf32>, vector<2x96xf32> -> vector<2x96xf32>
    %47 = vector.broadcast %23 : vector<1x96xf32> to vector<2x96xf32>
    %48 = arith.addf %46, %47 : vector<2x96xf32>
    %49 = vector.extract_strided_slice %48 {offsets = [0, 0], sizes = [2, 64], strides = [1, 1]} : vector<2x96xf32> to vector<2x64xf32>
    %cst_27 = arith.constant 5.000000e-01 : f32
    %50 = vector.broadcast %cst_27 : f32 to vector<2x64xf32>
    %51 = arith.mulf %50, %49 : vector<2x64xf32>
    %52 = math.tanh %51 : vector<2x64xf32>
    %cst_28 = arith.constant 5.000000e-01 : f32
    %53 = vector.broadcast %cst_28 : f32 to vector<2x64xf32>
    %54 = arith.mulf %53, %52 : vector<2x64xf32>
    %cst_29 = arith.constant 5.000000e-01 : f32
    %55 = vector.broadcast %cst_29 : f32 to vector<2x64xf32>
    %56 = arith.addf %54, %55 : vector<2x64xf32>
    %57 = vector.extract_strided_slice %56 {offsets = [0, 0], sizes = [2, 32], strides = [1, 1]} : vector<2x64xf32> to vector<2x32xf32>
    %58 = vector.extract_strided_slice %56 {offsets = [0, 32], sizes = [2, 32], strides = [1, 1]} : vector<2x64xf32> to vector<2x32xf32>
    %59 = vector.extract_strided_slice %48 {offsets = [0, 64], sizes = [2, 32], strides = [1, 1]} : vector<2x96xf32> to vector<2x32xf32>
    %60 = vector.broadcast %25 : vector<1x32xf32> to vector<2x32xf32>
    %61 = arith.mulf %57, %60 : vector<2x32xf32>
    %62 = arith.addf %59, %61 : vector<2x32xf32>
    %63 = math.tanh %62 : vector<2x32xf32>
    %cst_30 = arith.constant 1.000000e+00 : f32
    %64 = vector.broadcast %cst_30 : f32 to vector<2x32xf32>
    %65 = arith.subf %64, %58 : vector<2x32xf32>
    %66 = arith.mulf %65, %63 : vector<2x32xf32>
    %c0_31 = arith.constant 0 : index
    %c0_32 = arith.constant 0 : index
    %67 = vector.load %arg4[%c0_31, %c0_32] : memref<264x128xf32, #tpu.memory_space<vmem>>, vector<32x128xf32>
    %cst_33 = arith.constant dense<0.000000e+00> : vector<2x128xf32>
    %68 = tpu.matmul %66, %67, %cst_33 {dimension_numbers = #tpu.dot_dimension_numbers<[1], [0], [0], [1], [0, 0, 1, 1], [], []>} : vector<2x32xf32>, vector<32x128xf32>, vector<2x128xf32> -> vector<2x128xf32>
    %69 = arith.addf %26, %68 : vector<2x128xf32>
    %70 = vector.extract_strided_slice %19 {offsets = [0, 96], sizes = [2, 96], strides = [1, 1]} : vector<2x768xf32> to vector<2x96xf32>
    %cst_34 = arith.constant dense<0.000000e+00> : vector<2x96xf32>
    %71 = tpu.matmul %45, %20, %cst_34 {dimension_numbers = #tpu.dot_dimension_numbers<[1], [0], [0], [1], [0, 0, 1, 1], [], []>} : vector<2x32xf32>, vector<32x96xf32>, vector<2x96xf32> -> vector<2x96xf32>
    %72 = vector.extract_strided_slice %70 {offsets = [0, 0], sizes = [2, 64], strides = [1, 1]} : vector<2x96xf32> to vector<2x64xf32>
    %73 = vector.extract_strided_slice %71 {offsets = [0, 0], sizes = [2, 64], strides = [1, 1]} : vector<2x96xf32> to vector<2x64xf32>
    %74 = arith.addf %72, %73 : vector<2x64xf32>
    %cst_35 = arith.constant 5.000000e-01 : f32
    %75 = vector.broadcast %cst_35 : f32 to vector<2x64xf32>
    %76 = arith.mulf %75, %74 : vector<2x64xf32>
    %77 = math.tanh %76 : vector<2x64xf32>
    %cst_36 = arith.constant 5.000000e-01 : f32
    %78 = vector.broadcast %cst_36 : f32 to vector<2x64xf32>
    %79 = arith.mulf %78, %77 : vector<2x64xf32>
    %cst_37 = arith.constant 5.000000e-01 : f32
    %80 = vector.broadcast %cst_37 : f32 to vector<2x64xf32>
    %81 = arith.addf %79, %80 : vector<2x64xf32>
    %82 = vector.extract_strided_slice %81 {offsets = [0, 0], sizes = [2, 32], strides = [1, 1]} : vector<2x64xf32> to vector<2x32xf32>
    %83 = vector.extract_strided_slice %81 {offsets = [0, 32], sizes = [2, 32], strides = [1, 1]} : vector<2x64xf32> to vector<2x32xf32>
    %84 = vector.extract_strided_slice %70 {offsets = [0, 64], sizes = [2, 32], strides = [1, 1]} : vector<2x96xf32> to vector<2x32xf32>
    %85 = vector.extract_strided_slice %71 {offsets = [0, 64], sizes = [2, 32], strides = [1, 1]} : vector<2x96xf32> to vector<2x32xf32>
    %86 = vector.broadcast %24 : vector<1x32xf32> to vector<2x32xf32>
    %87 = arith.addf %85, %86 : vector<2x32xf32>
    %88 = arith.mulf %82, %87 : vector<2x32xf32>
    %89 = arith.addf %84, %88 : vector<2x32xf32>
    %90 = math.tanh %89 : vector<2x32xf32>
    %cst_38 = arith.constant 1.000000e+00 : f32
    %91 = vector.broadcast %cst_38 : f32 to vector<2x32xf32>
    %92 = arith.subf %91, %83 : vector<2x32xf32>
    %93 = arith.mulf %92, %90 : vector<2x32xf32>
    %94 = arith.mulf %83, %45 : vector<2x32xf32>
    %95 = arith.addf %93, %94 : vector<2x32xf32>
    %cst_39 = arith.constant dense<0.000000e+00> : vector<2x96xf32>
    %96 = tpu.matmul %95, %21, %cst_39 {dimension_numbers = #tpu.dot_dimension_numbers<[1], [0], [0], [1], [0, 0, 1, 1], [], []>} : vector<2x32xf32>, vector<32x96xf32>, vector<2x96xf32> -> vector<2x96xf32>
    %97 = vector.broadcast %23 : vector<1x96xf32> to vector<2x96xf32>
    %98 = arith.addf %96, %97 : vector<2x96xf32>
    %cst_40 = arith.constant dense<0.000000e+00> : vector<2x96xf32>
    %99 = tpu.matmul %66, %22, %cst_40 {dimension_numbers = #tpu.dot_dimension_numbers<[1], [0], [0], [1], [0, 0, 1, 1], [], []>} : vector<2x32xf32>, vector<32x96xf32>, vector<2x96xf32> -> vector<2x96xf32>
    %100 = vector.extract_strided_slice %98 {offsets = [0, 0], sizes = [2, 64], strides = [1, 1]} : vector<2x96xf32> to vector<2x64xf32>
    %101 = vector.extract_strided_slice %99 {offsets = [0, 0], sizes = [2, 64], strides = [1, 1]} : vector<2x96xf32> to vector<2x64xf32>
    %102 = arith.addf %100, %101 : vector<2x64xf32>
    %cst_41 = arith.constant 5.000000e-01 : f32
    %103 = vector.broadcast %cst_41 : f32 to vector<2x64xf32>
    %104 = arith.mulf %103, %102 : vector<2x64xf32>
    %105 = math.tanh %104 : vector<2x64xf32>
    %cst_42 = arith.constant 5.000000e-01 : f32
    %106 = vector.broadcast %cst_42 : f32 to vector<2x64xf32>
    %107 = arith.mulf %106, %105 : vector<2x64xf32>
    %cst_43 = arith.constant 5.000000e-01 : f32
    %108 = vector.broadcast %cst_43 : f32 to vector<2x64xf32>
    %109 = arith.addf %107, %108 : vector<2x64xf32>
    %110 = vector.extract_strided_slice %109 {offsets = [0, 0], sizes = [2, 32], strides = [1, 1]} : vector<2x64xf32> to vector<2x32xf32>
    %111 = vector.extract_strided_slice %109 {offsets = [0, 32], sizes = [2, 32], strides = [1, 1]} : vector<2x64xf32> to vector<2x32xf32>
    %112 = vector.extract_strided_slice %98 {offsets = [0, 64], sizes = [2, 32], strides = [1, 1]} : vector<2x96xf32> to vector<2x32xf32>
    %113 = vector.extract_strided_slice %99 {offsets = [0, 64], sizes = [2, 32], strides = [1, 1]} : vector<2x96xf32> to vector<2x32xf32>
    %114 = vector.broadcast %25 : vector<1x32xf32> to vector<2x32xf32>
    %115 = arith.addf %113, %114 : vector<2x32xf32>
    %116 = arith.mulf %110, %115 : vector<2x32xf32>
    %117 = arith.addf %112, %116 : vector<2x32xf32>
    %118 = math.tanh %117 : vector<2x32xf32>
    %cst_44 = arith.constant 1.000000e+00 : f32
    %119 = vector.broadcast %cst_44 : f32 to vector<2x32xf32>
    %120 = arith.subf %119, %111 : vector<2x32xf32>
    %121 = arith.mulf %120, %118 : vector<2x32xf32>
    %122 = arith.mulf %111, %66 : vector<2x32xf32>
    %123 = arith.addf %121, %122 : vector<2x32xf32>
    %c32_45 = arith.constant 32 : index
    %c0_46 = arith.constant 0 : index
    %124 = vector.load %arg4[%c32_45, %c0_46] : memref<264x128xf32, #tpu.memory_space<vmem>>, vector<32x128xf32>
    %cst_47 = arith.constant dense<0.000000e+00> : vector<2x128xf32>
    %125 = tpu.matmul %123, %124, %cst_47 {dimension_numbers = #tpu.dot_dimension_numbers<[1], [0], [0], [1], [0, 0, 1, 1], [], []>} : vector<2x32xf32>, vector<32x128xf32>, vector<2x128xf32> -> vector<2x128xf32>
    %126 = arith.addf %69, %125 : vector<2x128xf32>
    %127 = vector.extract_strided_slice %19 {offsets = [0, 192], sizes = [2, 96], strides = [1, 1]} : vector<2x768xf32> to vector<2x96xf32>
    %cst_48 = arith.constant dense<0.000000e+00> : vector<2x96xf32>
    %128 = tpu.matmul %95, %20, %cst_48 {dimension_numbers = #tpu.dot_dimension_numbers<[1], [0], [0], [1], [0, 0, 1, 1], [], []>} : vector<2x32xf32>, vector<32x96xf32>, vector<2x96xf32> -> vector<2x96xf32>
    %129 = vector.extract_strided_slice %127 {offsets = [0, 0], sizes = [2, 64], strides = [1, 1]} : vector<2x96xf32> to vector<2x64xf32>
    %130 = vector.extract_strided_slice %128 {offsets = [0, 0], sizes = [2, 64], strides = [1, 1]} : vector<2x96xf32> to vector<2x64xf32>
    %131 = arith.addf %129, %130 : vector<2x64xf32>
    %cst_49 = arith.constant 5.000000e-01 : f32
    %132 = vector.broadcast %cst_49 : f32 to vector<2x64xf32>
    %133 = arith.mulf %132, %131 : vector<2x64xf32>
    %134 = math.tanh %133 : vector<2x64xf32>
    %cst_50 = arith.constant 5.000000e-01 : f32
    %135 = vector.broadcast %cst_50 : f32 to vector<2x64xf32>
    %136 = arith.mulf %135, %134 : vector<2x64xf32>
    %cst_51 = arith.constant 5.000000e-01 : f32
    %137 = vector.broadcast %cst_51 : f32 to vector<2x64xf32>
    %138 = arith.addf %136, %137 : vector<2x64xf32>
    %139 = vector.extract_strided_slice %138 {offsets = [0, 0], sizes = [2, 32], strides = [1, 1]} : vector<2x64xf32> to vector<2x32xf32>
    %140 = vector.extract_strided_slice %138 {offsets = [0, 32], sizes = [2, 32], strides = [1, 1]} : vector<2x64xf32> to vector<2x32xf32>
    %141 = vector.extract_strided_slice %127 {offsets = [0, 64], sizes = [2, 32], strides = [1, 1]} : vector<2x96xf32> to vector<2x32xf32>
    %142 = vector.extract_strided_slice %128 {offsets = [0, 64], sizes = [2, 32], strides = [1, 1]} : vector<2x96xf32> to vector<2x32xf32>
    %143 = vector.broadcast %24 : vector<1x32xf32> to vector<2x32xf32>
    %144 = arith.addf %142, %143 : vector<2x32xf32>
    %145 = arith.mulf %139, %144 : vector<2x32xf32>
    %146 = arith.addf %141, %145 : vector<2x32xf32>
    %147 = math.tanh %146 : vector<2x32xf32>
    %cst_52 = arith.constant 1.000000e+00 : f32
    %148 = vector.broadcast %cst_52 : f32 to vector<2x32xf32>
    %149 = arith.subf %148, %140 : vector<2x32xf32>
    %150 = arith.mulf %149, %147 : vector<2x32xf32>
    %151 = arith.mulf %140, %95 : vector<2x32xf32>
    %152 = arith.addf %150, %151 : vector<2x32xf32>
    %cst_53 = arith.constant dense<0.000000e+00> : vector<2x96xf32>
    %153 = tpu.matmul %152, %21, %cst_53 {dimension_numbers = #tpu.dot_dimension_numbers<[1], [0], [0], [1], [0, 0, 1, 1], [], []>} : vector<2x32xf32>, vector<32x96xf32>, vector<2x96xf32> -> vector<2x96xf32>
    %154 = vector.broadcast %23 : vector<1x96xf32> to vector<2x96xf32>
    %155 = arith.addf %153, %154 : vector<2x96xf32>
    %cst_54 = arith.constant dense<0.000000e+00> : vector<2x96xf32>
    %156 = tpu.matmul %123, %22, %cst_54 {dimension_numbers = #tpu.dot_dimension_numbers<[1], [0], [0], [1], [0, 0, 1, 1], [], []>} : vector<2x32xf32>, vector<32x96xf32>, vector<2x96xf32> -> vector<2x96xf32>
    %157 = vector.extract_strided_slice %155 {offsets = [0, 0], sizes = [2, 64], strides = [1, 1]} : vector<2x96xf32> to vector<2x64xf32>
    %158 = vector.extract_strided_slice %156 {offsets = [0, 0], sizes = [2, 64], strides = [1, 1]} : vector<2x96xf32> to vector<2x64xf32>
    %159 = arith.addf %157, %158 : vector<2x64xf32>
    %cst_55 = arith.constant 5.000000e-01 : f32
    %160 = vector.broadcast %cst_55 : f32 to vector<2x64xf32>
    %161 = arith.mulf %160, %159 : vector<2x64xf32>
    %162 = math.tanh %161 : vector<2x64xf32>
    %cst_56 = arith.constant 5.000000e-01 : f32
    %163 = vector.broadcast %cst_56 : f32 to vector<2x64xf32>
    %164 = arith.mulf %163, %162 : vector<2x64xf32>
    %cst_57 = arith.constant 5.000000e-01 : f32
    %165 = vector.broadcast %cst_57 : f32 to vector<2x64xf32>
    %166 = arith.addf %164, %165 : vector<2x64xf32>
    %167 = vector.extract_strided_slice %166 {offsets = [0, 0], sizes = [2, 32], strides = [1, 1]} : vector<2x64xf32> to vector<2x32xf32>
    %168 = vector.extract_strided_slice %166 {offsets = [0, 32], sizes = [2, 32], strides = [1, 1]} : vector<2x64xf32> to vector<2x32xf32>
    %169 = vector.extract_strided_slice %155 {offsets = [0, 64], sizes = [2, 32], strides = [1, 1]} : vector<2x96xf32> to vector<2x32xf32>
    %170 = vector.extract_strided_slice %156 {offsets = [0, 64], sizes = [2, 32], strides = [1, 1]} : vector<2x96xf32> to vector<2x32xf32>
    %171 = vector.broadcast %25 : vector<1x32xf32> to vector<2x32xf32>
    %172 = arith.addf %170, %171 : vector<2x32xf32>
    %173 = arith.mulf %167, %172 : vector<2x32xf32>
    %174 = arith.addf %169, %173 : vector<2x32xf32>
    %175 = math.tanh %174 : vector<2x32xf32>
    %cst_58 = arith.constant 1.000000e+00 : f32
    %176 = vector.broadcast %cst_58 : f32 to vector<2x32xf32>
    %177 = arith.subf %176, %168 : vector<2x32xf32>
    %178 = arith.mulf %177, %175 : vector<2x32xf32>
    %179 = arith.mulf %168, %123 : vector<2x32xf32>
    %180 = arith.addf %178, %179 : vector<2x32xf32>
    %c64 = arith.constant 64 : index
    %c0_59 = arith.constant 0 : index
    %181 = vector.load %arg4[%c64, %c0_59] : memref<264x128xf32, #tpu.memory_space<vmem>>, vector<32x128xf32>
    %cst_60 = arith.constant dense<0.000000e+00> : vector<2x128xf32>
    %182 = tpu.matmul %180, %181, %cst_60 {dimension_numbers = #tpu.dot_dimension_numbers<[1], [0], [0], [1], [0, 0, 1, 1], [], []>} : vector<2x32xf32>, vector<32x128xf32>, vector<2x128xf32> -> vector<2x128xf32>
    %183 = arith.addf %126, %182 : vector<2x128xf32>
    %184 = vector.extract_strided_slice %19 {offsets = [0, 288], sizes = [2, 96], strides = [1, 1]} : vector<2x768xf32> to vector<2x96xf32>
    %cst_61 = arith.constant dense<0.000000e+00> : vector<2x96xf32>
    %185 = tpu.matmul %152, %20, %cst_61 {dimension_numbers = #tpu.dot_dimension_numbers<[1], [0], [0], [1], [0, 0, 1, 1], [], []>} : vector<2x32xf32>, vector<32x96xf32>, vector<2x96xf32> -> vector<2x96xf32>
    %186 = vector.extract_strided_slice %184 {offsets = [0, 0], sizes = [2, 64], strides = [1, 1]} : vector<2x96xf32> to vector<2x64xf32>
    %187 = vector.extract_strided_slice %185 {offsets = [0, 0], sizes = [2, 64], strides = [1, 1]} : vector<2x96xf32> to vector<2x64xf32>
    %188 = arith.addf %186, %187 : vector<2x64xf32>
    %cst_62 = arith.constant 5.000000e-01 : f32
    %189 = vector.broadcast %cst_62 : f32 to vector<2x64xf32>
    %190 = arith.mulf %189, %188 : vector<2x64xf32>
    %191 = math.tanh %190 : vector<2x64xf32>
    %cst_63 = arith.constant 5.000000e-01 : f32
    %192 = vector.broadcast %cst_63 : f32 to vector<2x64xf32>
    %193 = arith.mulf %192, %191 : vector<2x64xf32>
    %cst_64 = arith.constant 5.000000e-01 : f32
    %194 = vector.broadcast %cst_64 : f32 to vector<2x64xf32>
    %195 = arith.addf %193, %194 : vector<2x64xf32>
    %196 = vector.extract_strided_slice %195 {offsets = [0, 0], sizes = [2, 32], strides = [1, 1]} : vector<2x64xf32> to vector<2x32xf32>
    %197 = vector.extract_strided_slice %195 {offsets = [0, 32], sizes = [2, 32], strides = [1, 1]} : vector<2x64xf32> to vector<2x32xf32>
    %198 = vector.extract_strided_slice %184 {offsets = [0, 64], sizes = [2, 32], strides = [1, 1]} : vector<2x96xf32> to vector<2x32xf32>
    %199 = vector.extract_strided_slice %185 {offsets = [0, 64], sizes = [2, 32], strides = [1, 1]} : vector<2x96xf32> to vector<2x32xf32>
    %200 = vector.broadcast %24 : vector<1x32xf32> to vector<2x32xf32>
    %201 = arith.addf %199, %200 : vector<2x32xf32>
    %202 = arith.mulf %196, %201 : vector<2x32xf32>
    %203 = arith.addf %198, %202 : vector<2x32xf32>
    %204 = math.tanh %203 : vector<2x32xf32>
    %cst_65 = arith.constant 1.000000e+00 : f32
    %205 = vector.broadcast %cst_65 : f32 to vector<2x32xf32>
    %206 = arith.subf %205, %197 : vector<2x32xf32>
    %207 = arith.mulf %206, %204 : vector<2x32xf32>
    %208 = arith.mulf %197, %152 : vector<2x32xf32>
    %209 = arith.addf %207, %208 : vector<2x32xf32>
    %cst_66 = arith.constant dense<0.000000e+00> : vector<2x96xf32>
    %210 = tpu.matmul %209, %21, %cst_66 {dimension_numbers = #tpu.dot_dimension_numbers<[1], [0], [0], [1], [0, 0, 1, 1], [], []>} : vector<2x32xf32>, vector<32x96xf32>, vector<2x96xf32> -> vector<2x96xf32>
    %211 = vector.broadcast %23 : vector<1x96xf32> to vector<2x96xf32>
    %212 = arith.addf %210, %211 : vector<2x96xf32>
    %cst_67 = arith.constant dense<0.000000e+00> : vector<2x96xf32>
    %213 = tpu.matmul %180, %22, %cst_67 {dimension_numbers = #tpu.dot_dimension_numbers<[1], [0], [0], [1], [0, 0, 1, 1], [], []>} : vector<2x32xf32>, vector<32x96xf32>, vector<2x96xf32> -> vector<2x96xf32>
    %214 = vector.extract_strided_slice %212 {offsets = [0, 0], sizes = [2, 64], strides = [1, 1]} : vector<2x96xf32> to vector<2x64xf32>
    %215 = vector.extract_strided_slice %213 {offsets = [0, 0], sizes = [2, 64], strides = [1, 1]} : vector<2x96xf32> to vector<2x64xf32>
    %216 = arith.addf %214, %215 : vector<2x64xf32>
    %cst_68 = arith.constant 5.000000e-01 : f32
    %217 = vector.broadcast %cst_68 : f32 to vector<2x64xf32>
    %218 = arith.mulf %217, %216 : vector<2x64xf32>
    %219 = math.tanh %218 : vector<2x64xf32>
    %cst_69 = arith.constant 5.000000e-01 : f32
    %220 = vector.broadcast %cst_69 : f32 to vector<2x64xf32>
    %221 = arith.mulf %220, %219 : vector<2x64xf32>
    %cst_70 = arith.constant 5.000000e-01 : f32
    %222 = vector.broadcast %cst_70 : f32 to vector<2x64xf32>
    %223 = arith.addf %221, %222 : vector<2x64xf32>
    %224 = vector.extract_strided_slice %223 {offsets = [0, 0], sizes = [2, 32], strides = [1, 1]} : vector<2x64xf32> to vector<2x32xf32>
    %225 = vector.extract_strided_slice %223 {offsets = [0, 32], sizes = [2, 32], strides = [1, 1]} : vector<2x64xf32> to vector<2x32xf32>
    %226 = vector.extract_strided_slice %212 {offsets = [0, 64], sizes = [2, 32], strides = [1, 1]} : vector<2x96xf32> to vector<2x32xf32>
    %227 = vector.extract_strided_slice %213 {offsets = [0, 64], sizes = [2, 32], strides = [1, 1]} : vector<2x96xf32> to vector<2x32xf32>
    %228 = vector.broadcast %25 : vector<1x32xf32> to vector<2x32xf32>
    %229 = arith.addf %227, %228 : vector<2x32xf32>
    %230 = arith.mulf %224, %229 : vector<2x32xf32>
    %231 = arith.addf %226, %230 : vector<2x32xf32>
    %232 = math.tanh %231 : vector<2x32xf32>
    %cst_71 = arith.constant 1.000000e+00 : f32
    %233 = vector.broadcast %cst_71 : f32 to vector<2x32xf32>
    %234 = arith.subf %233, %225 : vector<2x32xf32>
    %235 = arith.mulf %234, %232 : vector<2x32xf32>
    %236 = arith.mulf %225, %180 : vector<2x32xf32>
    %237 = arith.addf %235, %236 : vector<2x32xf32>
    %c96_72 = arith.constant 96 : index
    %c0_73 = arith.constant 0 : index
    %238 = vector.load %arg4[%c96_72, %c0_73] : memref<264x128xf32, #tpu.memory_space<vmem>>, vector<32x128xf32>
    %cst_74 = arith.constant dense<0.000000e+00> : vector<2x128xf32>
    %239 = tpu.matmul %237, %238, %cst_74 {dimension_numbers = #tpu.dot_dimension_numbers<[1], [0], [0], [1], [0, 0, 1, 1], [], []>} : vector<2x32xf32>, vector<32x128xf32>, vector<2x128xf32> -> vector<2x128xf32>
    %240 = arith.addf %183, %239 : vector<2x128xf32>
    %241 = vector.extract_strided_slice %19 {offsets = [0, 384], sizes = [2, 96], strides = [1, 1]} : vector<2x768xf32> to vector<2x96xf32>
    %cst_75 = arith.constant dense<0.000000e+00> : vector<2x96xf32>
    %242 = tpu.matmul %209, %20, %cst_75 {dimension_numbers = #tpu.dot_dimension_numbers<[1], [0], [0], [1], [0, 0, 1, 1], [], []>} : vector<2x32xf32>, vector<32x96xf32>, vector<2x96xf32> -> vector<2x96xf32>
    %243 = vector.extract_strided_slice %241 {offsets = [0, 0], sizes = [2, 64], strides = [1, 1]} : vector<2x96xf32> to vector<2x64xf32>
    %244 = vector.extract_strided_slice %242 {offsets = [0, 0], sizes = [2, 64], strides = [1, 1]} : vector<2x96xf32> to vector<2x64xf32>
    %245 = arith.addf %243, %244 : vector<2x64xf32>
    %cst_76 = arith.constant 5.000000e-01 : f32
    %246 = vector.broadcast %cst_76 : f32 to vector<2x64xf32>
    %247 = arith.mulf %246, %245 : vector<2x64xf32>
    %248 = math.tanh %247 : vector<2x64xf32>
    %cst_77 = arith.constant 5.000000e-01 : f32
    %249 = vector.broadcast %cst_77 : f32 to vector<2x64xf32>
    %250 = arith.mulf %249, %248 : vector<2x64xf32>
    %cst_78 = arith.constant 5.000000e-01 : f32
    %251 = vector.broadcast %cst_78 : f32 to vector<2x64xf32>
    %252 = arith.addf %250, %251 : vector<2x64xf32>
    %253 = vector.extract_strided_slice %252 {offsets = [0, 0], sizes = [2, 32], strides = [1, 1]} : vector<2x64xf32> to vector<2x32xf32>
    %254 = vector.extract_strided_slice %252 {offsets = [0, 32], sizes = [2, 32], strides = [1, 1]} : vector<2x64xf32> to vector<2x32xf32>
    %255 = vector.extract_strided_slice %241 {offsets = [0, 64], sizes = [2, 32], strides = [1, 1]} : vector<2x96xf32> to vector<2x32xf32>
    %256 = vector.extract_strided_slice %242 {offsets = [0, 64], sizes = [2, 32], strides = [1, 1]} : vector<2x96xf32> to vector<2x32xf32>
    %257 = vector.broadcast %24 : vector<1x32xf32> to vector<2x32xf32>
    %258 = arith.addf %256, %257 : vector<2x32xf32>
    %259 = arith.mulf %253, %258 : vector<2x32xf32>
    %260 = arith.addf %255, %259 : vector<2x32xf32>
    %261 = math.tanh %260 : vector<2x32xf32>
    %cst_79 = arith.constant 1.000000e+00 : f32
    %262 = vector.broadcast %cst_79 : f32 to vector<2x32xf32>
    %263 = arith.subf %262, %254 : vector<2x32xf32>
    %264 = arith.mulf %263, %261 : vector<2x32xf32>
    %265 = arith.mulf %254, %209 : vector<2x32xf32>
    %266 = arith.addf %264, %265 : vector<2x32xf32>
    %cst_80 = arith.constant dense<0.000000e+00> : vector<2x96xf32>
    %267 = tpu.matmul %266, %21, %cst_80 {dimension_numbers = #tpu.dot_dimension_numbers<[1], [0], [0], [1], [0, 0, 1, 1], [], []>} : vector<2x32xf32>, vector<32x96xf32>, vector<2x96xf32> -> vector<2x96xf32>
    %268 = vector.broadcast %23 : vector<1x96xf32> to vector<2x96xf32>
    %269 = arith.addf %267, %268 : vector<2x96xf32>
    %cst_81 = arith.constant dense<0.000000e+00> : vector<2x96xf32>
    %270 = tpu.matmul %237, %22, %cst_81 {dimension_numbers = #tpu.dot_dimension_numbers<[1], [0], [0], [1], [0, 0, 1, 1], [], []>} : vector<2x32xf32>, vector<32x96xf32>, vector<2x96xf32> -> vector<2x96xf32>
    %271 = vector.extract_strided_slice %269 {offsets = [0, 0], sizes = [2, 64], strides = [1, 1]} : vector<2x96xf32> to vector<2x64xf32>
    %272 = vector.extract_strided_slice %270 {offsets = [0, 0], sizes = [2, 64], strides = [1, 1]} : vector<2x96xf32> to vector<2x64xf32>
    %273 = arith.addf %271, %272 : vector<2x64xf32>
    %cst_82 = arith.constant 5.000000e-01 : f32
    %274 = vector.broadcast %cst_82 : f32 to vector<2x64xf32>
    %275 = arith.mulf %274, %273 : vector<2x64xf32>
    %276 = math.tanh %275 : vector<2x64xf32>
    %cst_83 = arith.constant 5.000000e-01 : f32
    %277 = vector.broadcast %cst_83 : f32 to vector<2x64xf32>
    %278 = arith.mulf %277, %276 : vector<2x64xf32>
    %cst_84 = arith.constant 5.000000e-01 : f32
    %279 = vector.broadcast %cst_84 : f32 to vector<2x64xf32>
    %280 = arith.addf %278, %279 : vector<2x64xf32>
    %281 = vector.extract_strided_slice %280 {offsets = [0, 0], sizes = [2, 32], strides = [1, 1]} : vector<2x64xf32> to vector<2x32xf32>
    %282 = vector.extract_strided_slice %280 {offsets = [0, 32], sizes = [2, 32], strides = [1, 1]} : vector<2x64xf32> to vector<2x32xf32>
    %283 = vector.extract_strided_slice %269 {offsets = [0, 64], sizes = [2, 32], strides = [1, 1]} : vector<2x96xf32> to vector<2x32xf32>
    %284 = vector.extract_strided_slice %270 {offsets = [0, 64], sizes = [2, 32], strides = [1, 1]} : vector<2x96xf32> to vector<2x32xf32>
    %285 = vector.broadcast %25 : vector<1x32xf32> to vector<2x32xf32>
    %286 = arith.addf %284, %285 : vector<2x32xf32>
    %287 = arith.mulf %281, %286 : vector<2x32xf32>
    %288 = arith.addf %283, %287 : vector<2x32xf32>
    %289 = math.tanh %288 : vector<2x32xf32>
    %cst_85 = arith.constant 1.000000e+00 : f32
    %290 = vector.broadcast %cst_85 : f32 to vector<2x32xf32>
    %291 = arith.subf %290, %282 : vector<2x32xf32>
    %292 = arith.mulf %291, %289 : vector<2x32xf32>
    %293 = arith.mulf %282, %237 : vector<2x32xf32>
    %294 = arith.addf %292, %293 : vector<2x32xf32>
    %c128 = arith.constant 128 : index
    %c0_86 = arith.constant 0 : index
    %295 = vector.load %arg4[%c128, %c0_86] : memref<264x128xf32, #tpu.memory_space<vmem>>, vector<32x128xf32>
    %cst_87 = arith.constant dense<0.000000e+00> : vector<2x128xf32>
    %296 = tpu.matmul %294, %295, %cst_87 {dimension_numbers = #tpu.dot_dimension_numbers<[1], [0], [0], [1], [0, 0, 1, 1], [], []>} : vector<2x32xf32>, vector<32x128xf32>, vector<2x128xf32> -> vector<2x128xf32>
    %297 = arith.addf %240, %296 : vector<2x128xf32>
    %298 = vector.extract_strided_slice %19 {offsets = [0, 480], sizes = [2, 96], strides = [1, 1]} : vector<2x768xf32> to vector<2x96xf32>
    %cst_88 = arith.constant dense<0.000000e+00> : vector<2x96xf32>
    %299 = tpu.matmul %266, %20, %cst_88 {dimension_numbers = #tpu.dot_dimension_numbers<[1], [0], [0], [1], [0, 0, 1, 1], [], []>} : vector<2x32xf32>, vector<32x96xf32>, vector<2x96xf32> -> vector<2x96xf32>
    %300 = vector.extract_strided_slice %298 {offsets = [0, 0], sizes = [2, 64], strides = [1, 1]} : vector<2x96xf32> to vector<2x64xf32>
    %301 = vector.extract_strided_slice %299 {offsets = [0, 0], sizes = [2, 64], strides = [1, 1]} : vector<2x96xf32> to vector<2x64xf32>
    %302 = arith.addf %300, %301 : vector<2x64xf32>
    %cst_89 = arith.constant 5.000000e-01 : f32
    %303 = vector.broadcast %cst_89 : f32 to vector<2x64xf32>
    %304 = arith.mulf %303, %302 : vector<2x64xf32>
    %305 = math.tanh %304 : vector<2x64xf32>
    %cst_90 = arith.constant 5.000000e-01 : f32
    %306 = vector.broadcast %cst_90 : f32 to vector<2x64xf32>
    %307 = arith.mulf %306, %305 : vector<2x64xf32>
    %cst_91 = arith.constant 5.000000e-01 : f32
    %308 = vector.broadcast %cst_91 : f32 to vector<2x64xf32>
    %309 = arith.addf %307, %308 : vector<2x64xf32>
    %310 = vector.extract_strided_slice %309 {offsets = [0, 0], sizes = [2, 32], strides = [1, 1]} : vector<2x64xf32> to vector<2x32xf32>
    %311 = vector.extract_strided_slice %309 {offsets = [0, 32], sizes = [2, 32], strides = [1, 1]} : vector<2x64xf32> to vector<2x32xf32>
    %312 = vector.extract_strided_slice %298 {offsets = [0, 64], sizes = [2, 32], strides = [1, 1]} : vector<2x96xf32> to vector<2x32xf32>
    %313 = vector.extract_strided_slice %299 {offsets = [0, 64], sizes = [2, 32], strides = [1, 1]} : vector<2x96xf32> to vector<2x32xf32>
    %314 = vector.broadcast %24 : vector<1x32xf32> to vector<2x32xf32>
    %315 = arith.addf %313, %314 : vector<2x32xf32>
    %316 = arith.mulf %310, %315 : vector<2x32xf32>
    %317 = arith.addf %312, %316 : vector<2x32xf32>
    %318 = math.tanh %317 : vector<2x32xf32>
    %cst_92 = arith.constant 1.000000e+00 : f32
    %319 = vector.broadcast %cst_92 : f32 to vector<2x32xf32>
    %320 = arith.subf %319, %311 : vector<2x32xf32>
    %321 = arith.mulf %320, %318 : vector<2x32xf32>
    %322 = arith.mulf %311, %266 : vector<2x32xf32>
    %323 = arith.addf %321, %322 : vector<2x32xf32>
    %cst_93 = arith.constant dense<0.000000e+00> : vector<2x96xf32>
    %324 = tpu.matmul %323, %21, %cst_93 {dimension_numbers = #tpu.dot_dimension_numbers<[1], [0], [0], [1], [0, 0, 1, 1], [], []>} : vector<2x32xf32>, vector<32x96xf32>, vector<2x96xf32> -> vector<2x96xf32>
    %325 = vector.broadcast %23 : vector<1x96xf32> to vector<2x96xf32>
    %326 = arith.addf %324, %325 : vector<2x96xf32>
    %cst_94 = arith.constant dense<0.000000e+00> : vector<2x96xf32>
    %327 = tpu.matmul %294, %22, %cst_94 {dimension_numbers = #tpu.dot_dimension_numbers<[1], [0], [0], [1], [0, 0, 1, 1], [], []>} : vector<2x32xf32>, vector<32x96xf32>, vector<2x96xf32> -> vector<2x96xf32>
    %328 = vector.extract_strided_slice %326 {offsets = [0, 0], sizes = [2, 64], strides = [1, 1]} : vector<2x96xf32> to vector<2x64xf32>
    %329 = vector.extract_strided_slice %327 {offsets = [0, 0], sizes = [2, 64], strides = [1, 1]} : vector<2x96xf32> to vector<2x64xf32>
    %330 = arith.addf %328, %329 : vector<2x64xf32>
    %cst_95 = arith.constant 5.000000e-01 : f32
    %331 = vector.broadcast %cst_95 : f32 to vector<2x64xf32>
    %332 = arith.mulf %331, %330 : vector<2x64xf32>
    %333 = math.tanh %332 : vector<2x64xf32>
    %cst_96 = arith.constant 5.000000e-01 : f32
    %334 = vector.broadcast %cst_96 : f32 to vector<2x64xf32>
    %335 = arith.mulf %334, %333 : vector<2x64xf32>
    %cst_97 = arith.constant 5.000000e-01 : f32
    %336 = vector.broadcast %cst_97 : f32 to vector<2x64xf32>
    %337 = arith.addf %335, %336 : vector<2x64xf32>
    %338 = vector.extract_strided_slice %337 {offsets = [0, 0], sizes = [2, 32], strides = [1, 1]} : vector<2x64xf32> to vector<2x32xf32>
    %339 = vector.extract_strided_slice %337 {offsets = [0, 32], sizes = [2, 32], strides = [1, 1]} : vector<2x64xf32> to vector<2x32xf32>
    %340 = vector.extract_strided_slice %326 {offsets = [0, 64], sizes = [2, 32], strides = [1, 1]} : vector<2x96xf32> to vector<2x32xf32>
    %341 = vector.extract_strided_slice %327 {offsets = [0, 64], sizes = [2, 32], strides = [1, 1]} : vector<2x96xf32> to vector<2x32xf32>
    %342 = vector.broadcast %25 : vector<1x32xf32> to vector<2x32xf32>
    %343 = arith.addf %341, %342 : vector<2x32xf32>
    %344 = arith.mulf %338, %343 : vector<2x32xf32>
    %345 = arith.addf %340, %344 : vector<2x32xf32>
    %346 = math.tanh %345 : vector<2x32xf32>
    %cst_98 = arith.constant 1.000000e+00 : f32
    %347 = vector.broadcast %cst_98 : f32 to vector<2x32xf32>
    %348 = arith.subf %347, %339 : vector<2x32xf32>
    %349 = arith.mulf %348, %346 : vector<2x32xf32>
    %350 = arith.mulf %339, %294 : vector<2x32xf32>
    %351 = arith.addf %349, %350 : vector<2x32xf32>
    %c160 = arith.constant 160 : index
    %c0_99 = arith.constant 0 : index
    %352 = vector.load %arg4[%c160, %c0_99] : memref<264x128xf32, #tpu.memory_space<vmem>>, vector<32x128xf32>
    %cst_100 = arith.constant dense<0.000000e+00> : vector<2x128xf32>
    %353 = tpu.matmul %351, %352, %cst_100 {dimension_numbers = #tpu.dot_dimension_numbers<[1], [0], [0], [1], [0, 0, 1, 1], [], []>} : vector<2x32xf32>, vector<32x128xf32>, vector<2x128xf32> -> vector<2x128xf32>
    %354 = arith.addf %297, %353 : vector<2x128xf32>
    %355 = vector.extract_strided_slice %19 {offsets = [0, 576], sizes = [2, 96], strides = [1, 1]} : vector<2x768xf32> to vector<2x96xf32>
    %cst_101 = arith.constant dense<0.000000e+00> : vector<2x96xf32>
    %356 = tpu.matmul %323, %20, %cst_101 {dimension_numbers = #tpu.dot_dimension_numbers<[1], [0], [0], [1], [0, 0, 1, 1], [], []>} : vector<2x32xf32>, vector<32x96xf32>, vector<2x96xf32> -> vector<2x96xf32>
    %357 = vector.extract_strided_slice %355 {offsets = [0, 0], sizes = [2, 64], strides = [1, 1]} : vector<2x96xf32> to vector<2x64xf32>
    %358 = vector.extract_strided_slice %356 {offsets = [0, 0], sizes = [2, 64], strides = [1, 1]} : vector<2x96xf32> to vector<2x64xf32>
    %359 = arith.addf %357, %358 : vector<2x64xf32>
    %cst_102 = arith.constant 5.000000e-01 : f32
    %360 = vector.broadcast %cst_102 : f32 to vector<2x64xf32>
    %361 = arith.mulf %360, %359 : vector<2x64xf32>
    %362 = math.tanh %361 : vector<2x64xf32>
    %cst_103 = arith.constant 5.000000e-01 : f32
    %363 = vector.broadcast %cst_103 : f32 to vector<2x64xf32>
    %364 = arith.mulf %363, %362 : vector<2x64xf32>
    %cst_104 = arith.constant 5.000000e-01 : f32
    %365 = vector.broadcast %cst_104 : f32 to vector<2x64xf32>
    %366 = arith.addf %364, %365 : vector<2x64xf32>
    %367 = vector.extract_strided_slice %366 {offsets = [0, 0], sizes = [2, 32], strides = [1, 1]} : vector<2x64xf32> to vector<2x32xf32>
    %368 = vector.extract_strided_slice %366 {offsets = [0, 32], sizes = [2, 32], strides = [1, 1]} : vector<2x64xf32> to vector<2x32xf32>
    %369 = vector.extract_strided_slice %355 {offsets = [0, 64], sizes = [2, 32], strides = [1, 1]} : vector<2x96xf32> to vector<2x32xf32>
    %370 = vector.extract_strided_slice %356 {offsets = [0, 64], sizes = [2, 32], strides = [1, 1]} : vector<2x96xf32> to vector<2x32xf32>
    %371 = vector.broadcast %24 : vector<1x32xf32> to vector<2x32xf32>
    %372 = arith.addf %370, %371 : vector<2x32xf32>
    %373 = arith.mulf %367, %372 : vector<2x32xf32>
    %374 = arith.addf %369, %373 : vector<2x32xf32>
    %375 = math.tanh %374 : vector<2x32xf32>
    %cst_105 = arith.constant 1.000000e+00 : f32
    %376 = vector.broadcast %cst_105 : f32 to vector<2x32xf32>
    %377 = arith.subf %376, %368 : vector<2x32xf32>
    %378 = arith.mulf %377, %375 : vector<2x32xf32>
    %379 = arith.mulf %368, %323 : vector<2x32xf32>
    %380 = arith.addf %378, %379 : vector<2x32xf32>
    %cst_106 = arith.constant dense<0.000000e+00> : vector<2x96xf32>
    %381 = tpu.matmul %380, %21, %cst_106 {dimension_numbers = #tpu.dot_dimension_numbers<[1], [0], [0], [1], [0, 0, 1, 1], [], []>} : vector<2x32xf32>, vector<32x96xf32>, vector<2x96xf32> -> vector<2x96xf32>
    %382 = vector.broadcast %23 : vector<1x96xf32> to vector<2x96xf32>
    %383 = arith.addf %381, %382 : vector<2x96xf32>
    %cst_107 = arith.constant dense<0.000000e+00> : vector<2x96xf32>
    %384 = tpu.matmul %351, %22, %cst_107 {dimension_numbers = #tpu.dot_dimension_numbers<[1], [0], [0], [1], [0, 0, 1, 1], [], []>} : vector<2x32xf32>, vector<32x96xf32>, vector<2x96xf32> -> vector<2x96xf32>
    %385 = vector.extract_strided_slice %383 {offsets = [0, 0], sizes = [2, 64], strides = [1, 1]} : vector<2x96xf32> to vector<2x64xf32>
    %386 = vector.extract_strided_slice %384 {offsets = [0, 0], sizes = [2, 64], strides = [1, 1]} : vector<2x96xf32> to vector<2x64xf32>
    %387 = arith.addf %385, %386 : vector<2x64xf32>
    %cst_108 = arith.constant 5.000000e-01 : f32
    %388 = vector.broadcast %cst_108 : f32 to vector<2x64xf32>
    %389 = arith.mulf %388, %387 : vector<2x64xf32>
    %390 = math.tanh %389 : vector<2x64xf32>
    %cst_109 = arith.constant 5.000000e-01 : f32
    %391 = vector.broadcast %cst_109 : f32 to vector<2x64xf32>
    %392 = arith.mulf %391, %390 : vector<2x64xf32>
    %cst_110 = arith.constant 5.000000e-01 : f32
    %393 = vector.broadcast %cst_110 : f32 to vector<2x64xf32>
    %394 = arith.addf %392, %393 : vector<2x64xf32>
    %395 = vector.extract_strided_slice %394 {offsets = [0, 0], sizes = [2, 32], strides = [1, 1]} : vector<2x64xf32> to vector<2x32xf32>
    %396 = vector.extract_strided_slice %394 {offsets = [0, 32], sizes = [2, 32], strides = [1, 1]} : vector<2x64xf32> to vector<2x32xf32>
    %397 = vector.extract_strided_slice %383 {offsets = [0, 64], sizes = [2, 32], strides = [1, 1]} : vector<2x96xf32> to vector<2x32xf32>
    %398 = vector.extract_strided_slice %384 {offsets = [0, 64], sizes = [2, 32], strides = [1, 1]} : vector<2x96xf32> to vector<2x32xf32>
    %399 = vector.broadcast %25 : vector<1x32xf32> to vector<2x32xf32>
    %400 = arith.addf %398, %399 : vector<2x32xf32>
    %401 = arith.mulf %395, %400 : vector<2x32xf32>
    %402 = arith.addf %397, %401 : vector<2x32xf32>
    %403 = math.tanh %402 : vector<2x32xf32>
    %cst_111 = arith.constant 1.000000e+00 : f32
    %404 = vector.broadcast %cst_111 : f32 to vector<2x32xf32>
    %405 = arith.subf %404, %396 : vector<2x32xf32>
    %406 = arith.mulf %405, %403 : vector<2x32xf32>
    %407 = arith.mulf %396, %351 : vector<2x32xf32>
    %408 = arith.addf %406, %407 : vector<2x32xf32>
    %c192 = arith.constant 192 : index
    %c0_112 = arith.constant 0 : index
    %409 = vector.load %arg4[%c192, %c0_112] : memref<264x128xf32, #tpu.memory_space<vmem>>, vector<32x128xf32>
    %cst_113 = arith.constant dense<0.000000e+00> : vector<2x128xf32>
    %410 = tpu.matmul %408, %409, %cst_113 {dimension_numbers = #tpu.dot_dimension_numbers<[1], [0], [0], [1], [0, 0, 1, 1], [], []>} : vector<2x32xf32>, vector<32x128xf32>, vector<2x128xf32> -> vector<2x128xf32>
    %411 = arith.addf %354, %410 : vector<2x128xf32>
    %412 = vector.extract_strided_slice %19 {offsets = [0, 672], sizes = [2, 96], strides = [1, 1]} : vector<2x768xf32> to vector<2x96xf32>
    %cst_114 = arith.constant dense<0.000000e+00> : vector<2x96xf32>
    %413 = tpu.matmul %380, %20, %cst_114 {dimension_numbers = #tpu.dot_dimension_numbers<[1], [0], [0], [1], [0, 0, 1, 1], [], []>} : vector<2x32xf32>, vector<32x96xf32>, vector<2x96xf32> -> vector<2x96xf32>
    %414 = vector.extract_strided_slice %412 {offsets = [0, 0], sizes = [2, 64], strides = [1, 1]} : vector<2x96xf32> to vector<2x64xf32>
    %415 = vector.extract_strided_slice %413 {offsets = [0, 0], sizes = [2, 64], strides = [1, 1]} : vector<2x96xf32> to vector<2x64xf32>
    %416 = arith.addf %414, %415 : vector<2x64xf32>
    %cst_115 = arith.constant 5.000000e-01 : f32
    %417 = vector.broadcast %cst_115 : f32 to vector<2x64xf32>
    %418 = arith.mulf %417, %416 : vector<2x64xf32>
    %419 = math.tanh %418 : vector<2x64xf32>
    %cst_116 = arith.constant 5.000000e-01 : f32
    %420 = vector.broadcast %cst_116 : f32 to vector<2x64xf32>
    %421 = arith.mulf %420, %419 : vector<2x64xf32>
    %cst_117 = arith.constant 5.000000e-01 : f32
    %422 = vector.broadcast %cst_117 : f32 to vector<2x64xf32>
    %423 = arith.addf %421, %422 : vector<2x64xf32>
    %424 = vector.extract_strided_slice %423 {offsets = [0, 0], sizes = [2, 32], strides = [1, 1]} : vector<2x64xf32> to vector<2x32xf32>
    %425 = vector.extract_strided_slice %423 {offsets = [0, 32], sizes = [2, 32], strides = [1, 1]} : vector<2x64xf32> to vector<2x32xf32>
    %426 = vector.extract_strided_slice %412 {offsets = [0, 64], sizes = [2, 32], strides = [1, 1]} : vector<2x96xf32> to vector<2x32xf32>
    %427 = vector.extract_strided_slice %413 {offsets = [0, 64], sizes = [2, 32], strides = [1, 1]} : vector<2x96xf32> to vector<2x32xf32>
    %428 = vector.broadcast %24 : vector<1x32xf32> to vector<2x32xf32>
    %429 = arith.addf %427, %428 : vector<2x32xf32>
    %430 = arith.mulf %424, %429 : vector<2x32xf32>
    %431 = arith.addf %426, %430 : vector<2x32xf32>
    %432 = math.tanh %431 : vector<2x32xf32>
    %cst_118 = arith.constant 1.000000e+00 : f32
    %433 = vector.broadcast %cst_118 : f32 to vector<2x32xf32>
    %434 = arith.subf %433, %425 : vector<2x32xf32>
    %435 = arith.mulf %434, %432 : vector<2x32xf32>
    %436 = arith.mulf %425, %380 : vector<2x32xf32>
    %437 = arith.addf %435, %436 : vector<2x32xf32>
    %cst_119 = arith.constant dense<0.000000e+00> : vector<2x96xf32>
    %438 = tpu.matmul %437, %21, %cst_119 {dimension_numbers = #tpu.dot_dimension_numbers<[1], [0], [0], [1], [0, 0, 1, 1], [], []>} : vector<2x32xf32>, vector<32x96xf32>, vector<2x96xf32> -> vector<2x96xf32>
    %439 = vector.broadcast %23 : vector<1x96xf32> to vector<2x96xf32>
    %440 = arith.addf %438, %439 : vector<2x96xf32>
    %cst_120 = arith.constant dense<0.000000e+00> : vector<2x96xf32>
    %441 = tpu.matmul %408, %22, %cst_120 {dimension_numbers = #tpu.dot_dimension_numbers<[1], [0], [0], [1], [0, 0, 1, 1], [], []>} : vector<2x32xf32>, vector<32x96xf32>, vector<2x96xf32> -> vector<2x96xf32>
    %442 = vector.extract_strided_slice %440 {offsets = [0, 0], sizes = [2, 64], strides = [1, 1]} : vector<2x96xf32> to vector<2x64xf32>
    %443 = vector.extract_strided_slice %441 {offsets = [0, 0], sizes = [2, 64], strides = [1, 1]} : vector<2x96xf32> to vector<2x64xf32>
    %444 = arith.addf %442, %443 : vector<2x64xf32>
    %cst_121 = arith.constant 5.000000e-01 : f32
    %445 = vector.broadcast %cst_121 : f32 to vector<2x64xf32>
    %446 = arith.mulf %445, %444 : vector<2x64xf32>
    %447 = math.tanh %446 : vector<2x64xf32>
    %cst_122 = arith.constant 5.000000e-01 : f32
    %448 = vector.broadcast %cst_122 : f32 to vector<2x64xf32>
    %449 = arith.mulf %448, %447 : vector<2x64xf32>
    %cst_123 = arith.constant 5.000000e-01 : f32
    %450 = vector.broadcast %cst_123 : f32 to vector<2x64xf32>
    %451 = arith.addf %449, %450 : vector<2x64xf32>
    %452 = vector.extract_strided_slice %451 {offsets = [0, 0], sizes = [2, 32], strides = [1, 1]} : vector<2x64xf32> to vector<2x32xf32>
    %453 = vector.extract_strided_slice %451 {offsets = [0, 32], sizes = [2, 32], strides = [1, 1]} : vector<2x64xf32> to vector<2x32xf32>
    %454 = vector.extract_strided_slice %440 {offsets = [0, 64], sizes = [2, 32], strides = [1, 1]} : vector<2x96xf32> to vector<2x32xf32>
    %455 = vector.extract_strided_slice %441 {offsets = [0, 64], sizes = [2, 32], strides = [1, 1]} : vector<2x96xf32> to vector<2x32xf32>
    %456 = vector.broadcast %25 : vector<1x32xf32> to vector<2x32xf32>
    %457 = arith.addf %455, %456 : vector<2x32xf32>
    %458 = arith.mulf %452, %457 : vector<2x32xf32>
    %459 = arith.addf %454, %458 : vector<2x32xf32>
    %460 = math.tanh %459 : vector<2x32xf32>
    %cst_124 = arith.constant 1.000000e+00 : f32
    %461 = vector.broadcast %cst_124 : f32 to vector<2x32xf32>
    %462 = arith.subf %461, %453 : vector<2x32xf32>
    %463 = arith.mulf %462, %460 : vector<2x32xf32>
    %464 = arith.mulf %453, %408 : vector<2x32xf32>
    %465 = arith.addf %463, %464 : vector<2x32xf32>
    %c224 = arith.constant 224 : index
    %c0_125 = arith.constant 0 : index
    %466 = vector.load %arg4[%c224, %c0_125] : memref<264x128xf32, #tpu.memory_space<vmem>>, vector<32x128xf32>
    %cst_126 = arith.constant dense<0.000000e+00> : vector<2x128xf32>
    %467 = tpu.matmul %465, %466, %cst_126 {dimension_numbers = #tpu.dot_dimension_numbers<[1], [0], [0], [1], [0, 0, 1, 1], [], []>} : vector<2x32xf32>, vector<32x128xf32>, vector<2x128xf32> -> vector<2x128xf32>
    %468 = arith.addf %411, %467 : vector<2x128xf32>
    %c256 = arith.constant 256 : index
    %c0_127 = arith.constant 0 : index
    %469 = vector.load %arg4[%c256, %c0_127] : memref<264x128xf32, #tpu.memory_space<vmem>>, vector<1x128xf32>
    %470 = vector.broadcast %469 : vector<1x128xf32> to vector<2x128xf32>
    %471 = arith.addf %468, %470 : vector<2x128xf32>
    %c0_128 = arith.constant 0 : index
    %c0_129 = arith.constant 0 : index
    %472 = vector.load %arg5[%c0_128, %c0_129] : memref<2x128xf32, #tpu.memory_space<vmem>>, vector<2x128xf32>
    tpu.vector_store %arg5[%c0_128, %c0_129], %471 {strides = array<i32>} : memref<2x128xf32, #tpu.memory_space<vmem>>, vector<2x128xf32>,
    return
  }
}

</mosaic_0001>

<bundles_post_ra>
// kernel: forward.1
= control target key start
LH: loop header
LB: loop body
LE: loop exit
PB: predicated region body
PF: predicated region fallthrough
CT: control target
= control target key end

     0   :  { %10 = vsyncpa [#allocation3], 0  ;;  %s4736_s0 = inlined_call_operand.vmem [shape: f32[2,16], index: 0, kind: input, shape index: {}]   ;;  %s4737_s1 = inlined_call_operand.vmem [shape: f32[40,32], index: 1, kind: input, shape index: {}]   ;;  %s4738_s2 = inlined_call_operand.hbm [shape: f32[144,96], index: 2, kind: input, shape index: {}]   ;;  %s4739_s3 = inlined_call_operand.hbm [shape: f32[104,768], index: 3, kind: input, shape index: {}]   ;;  %s4740_s4 = inlined_call_operand.hbm [shape: f32[264,128], index: 4, kind: input, shape index: {}]   ;;  %s4741_s5 = inlined_call_operand.vmem [shape: f32[2,128], index: 5, kind: output, shape index: {}]  }
   0x1   :  { %11 = vsyncpa [#allocation5], 0  ;;  %s4201_s18 = smov [#allocation4]   ;;  %s4131_s22 = scalar_lea.hbm %s4739_s3, 9984 }
   0x2   :  { %s33_s19 = sshll.u32 %s4201_s18, 4  ;;  %p4132_p0 = scmp.ne.s32.totalorder %s4739_s3, %s4131_s22  ;;  %s34_s19 = int_to_ptr.vmem [resolvable:$true] %s33_s19 }
   0x3   :  { %p4135_p1 = scmp.lt.u32.totalorder %s4131_s22, %s4739_s3 }
   0x5   :  { %p4137_p2 = pnand %p4135_p1, %p4132_p0 }
   0x7   :  { %4140 = shalt.err (!%p4137_p2)
}
   0x8   :  { %s4141_s27 = scalar_lea.vmem %s34_s19, 9984  ;;  %p4146_p4 = scmp.lt.s32.totalorder %s34_s19, %s34_s19 }
   0x9   :  { %p4142_p3 = scmp.ne.s32.totalorder %s34_s19, %s4141_s27  ;;  %p4147_p5 = scmp.lt.s32.totalorder %s4141_s27, %s4141_s27 }
   0xb   :  { %p4148_p6 = por %p4147_p5, %p4146_p4 }
   0xd   :  { %p4149_p7 = pnand %p4148_p6, %p4142_p3 }
   0xf   :  { %4152 = shalt.err (!%p4149_p7)
}
  0x10   :  { %s4202_s28 = smov 768   ;;  %s4203_s29 = smov 48  }
  0x11   :  { %39 = dma.hbm_to_vmem [thread:$0]  %s4739_s3, 9984, %s34_s19, [#allocation5], %s4202_s28, %s4202_s28, %s4203_s29  }
  0x12   :  { %s4204_s7 = smov [#allocation2]   ;;  %s4153_s11 = scalar_lea.hbm %s4738_s2, 2304 }
  0x13   :  { %s21_s8 = sshll.u32 %s4204_s7, 4  ;;  %p4154_p8 = scmp.ne.s32.totalorder %s4738_s2, %s4153_s11  ;;  %s22_s8 = int_to_ptr.vmem [resolvable:$true] %s21_s8 }
  0x14   :  { %p4157_p9 = scmp.lt.u32.totalorder %s4153_s11, %s4738_s2 }
  0x16   :  { %p4159_p10 = pnand %p4157_p9, %p4154_p8 }
  0x18   :  { %4162 = shalt.err (!%p4159_p10)
}
  0x19   :  { %s4163_s16 = scalar_lea.vmem %s22_s8, 2304  ;;  %p4168_p12 = scmp.lt.s32.totalorder %s22_s8, %s22_s8 }
  0x1a   :  { %p4164_p11 = scmp.ne.s32.totalorder %s22_s8, %s4163_s16  ;;  %p4169_p13 = scmp.lt.s32.totalorder %s4163_s16, %s4163_s16 }
  0x1c   :  { %p4170_p0 = por %p4169_p13, %p4168_p12 }
  0x1e   :  { %p4171_p1 = pnand %p4170_p0, %p4164_p11 }
  0x20   :  { %4174 = shalt.err (!%p4171_p1)
}
  0x21   :  { %s4205_s3 = smov 128   ;;  %s4206_s17 = smov 8  }
  0x22   :  { %27 = dma.hbm_to_vmem [thread:$0]  %s4738_s2, 2304, %s22_s8, [#allocation3], %s4205_s3, %s4205_s3, %s4206_s17  }
  0x23   :  { %s4207_s20 = smov [#allocation6]   ;;  %s4175_s24 = scalar_lea.hbm %s4740_s4, 4224 }
  0x24   :  { %s45_s21 = sshll.u32 %s4207_s20, 4  ;;  %p4176_p2 = scmp.ne.s32.totalorder %s4740_s4, %s4175_s24  ;;  %s46_s21 = int_to_ptr.vmem [resolvable:$true] %s45_s21 }
  0x25   :  { %p4179_p3 = scmp.lt.u32.totalorder %s4175_s24, %s4740_s4 }
  0x27   :  { %p4181_p4 = pnand %p4179_p3, %p4176_p2 }
  0x29   :  { %4184 = shalt.err (!%p4181_p4)
}
  0x2a   :  { %s4185_s29 = scalar_lea.vmem %s46_s21, 4224  ;;  %p4190_p6 = scmp.lt.s32.totalorder %s46_s21, %s46_s21 }
  0x2b   :  { %p4186_p5 = scmp.ne.s32.totalorder %s46_s21, %s4185_s29  ;;  %p4191_p7 = scmp.lt.s32.totalorder %s4185_s29, %s4185_s29 }
  0x2d   :  { %p4192_p8 = por %p4191_p7, %p4190_p6 }
  0x2f   :  { %p4193_p9 = pnand %p4192_p8, %p4186_p5 }
  0x31   :  { %4196 = shalt.err (!%p4193_p9)
}
  0x32   :  { %51 = dma.hbm_to_vmem [thread:$0]  %s4740_s4, 4224, %s46_s21, [#allocation5], %s4205_s3, %s4205_s3, %s4206_s17  }
  0x33   :  { %4197 = dma.done.wait [#allocation3], 2304  }
  0x34   :  { %4198 = vsyncadd [#allocation3], 4294964992 }
  0x35   :  { %4199 = dma.done.wait [#allocation5], 14208  }
  0x36   :  { %4200 = vsyncadd [#allocation5], 4294953088  ;;  %v4208_v0 = vmov 0.0|0.0   ;;  %vm4209_vm0 = vmmov 0   ;;  %v4210_v1 = vmov 0.0   ;;  %v62_v2 = vld [vmem:[%s4737_s1] sm:$0xff] }
  0x37   :  { %3788 = vmatprep.subr.bf16.mxu0 %v4208_v0  ;;  %3444 = vmatprep.mubr.msk.f32.mxu0 %vm4209_vm0, %v4210_v1  ;;  %v63_v3 = vld [vmem:[%s4737_s1 + $0x8] sm:$0xff]  ;;  %v144_v5 = vld [vmem:[#allocation2] sm:$0xff]  ;;  %vm69_vm1 = vcmask 130048   ;;  %v146_v9 = vld [vmem:[#allocation2 + $0x10] sm:$0xff]  ;;  %vm153_vm2 = vcmask 261120   ;;  %vm335_vm3 = vcmask 785408  }
  0x38   :  { %3791 = vmatprep.subr.bf16.mxu1 %v4208_v0  ;;  %3455 = vmatprep.mubr.msk.f32.mxu1 %vm4209_vm0, %v4210_v1  ;;  %v3789_v4 = vpack.c.bf16 %v63_v3, %v62_v2  ;;  %v145_v6 = vld [vmem:[#allocation2 + $0x8] sm:$0xff]  ;;  %v61_v8 = vld [vmem:[%s4736_s0] sm:$0x3]  ;;  %v147_v10 = vld [vmem:[#allocation2 + $0x18] sm:$0xff]  ;;  %s4211_s14 = smov 64   ;;  %s4212_s15 = smov 96  }
  0x39   :  { %v3792_v7 = vpack.c.bf16 %v145_v6, %v144_v5  ;;  %v3795_v11 = vpack.c.bf16 %v147_v10, %v146_v9  ;;  %v229_v12 = vld [vmem:[#allocation4 + $0x8] sm:$0xff]  ;;  %v235_v13 = vld [vmem:[#allocation4 + $0x38] sm:$0xff]  ;;  %v228_v14 = vld [vmem:[#allocation4] sm:$0xff]  ;;  %s4213_s17 = smov 32  }
  0x3a   :  { %3790 = vmatpush3.bf16.msra.mxu0 %v3789_v4  ;;  %v3797_v15 = vpack.c.bf16 %v235_v13, %v229_v12  ;;  %v234_v16 = vld [vmem:[#allocation4 + $0x30] sm:$0xff]  ;;  %v231_v17 = vld [vmem:[#allocation4 + $0x18] sm:$0xff]  ;;  %v237_v18 = vld [vmem:[#allocation4 + $0x48] sm:$0xff] }
  0x3b   :  { %3793 = vmatpush3.bf16.msra.mxu1 %v3792_v7  ;;  %v3799_v19 = vpack.c.bf16 %v234_v16, %v228_v14  ;;  %v3821_v20 = vpack.c.bf16 %v237_v18, %v231_v17  ;;  %v241_v21 = vld [vmem:[#allocation4 + $0x68] sm:$0xff]  ;;  %v247_v22 = vld [vmem:[#allocation4 + $0x98] sm:$0xff]  ;;  %v240_v23 = vld [vmem:[#allocation4 + $0x60] sm:$0xff] }
  0x3c   :  { %3794 = vmatprep.subr.bf16.mxu1 %v4208_v0  ;;  %3798 = vmatprep.subr.bf16.mxu0 %v3797_v15  ;;  %v246_v24 = vld [vmem:[#allocation4 + $0x90] sm:$0xff]  ;;  %v3801_v25 = vpack.c.bf16 %v247_v22, %v241_v21  ;;  %v253_v27 = vld [vmem:[#allocation4 + $0xc8] sm:$0xff]  ;;  %v259_v28 = vld [vmem:[#allocation4 + $0xf8] sm:$0xff] }
  0x3d   :  { %3445 = vmatmul.mubr.msk.f32.vlgmr.msra.gmra.mrb[0].mxu0 %vm69_vm1, %v61_v8  ;;  %v3803_v26 = vpack.c.bf16 %v246_v24, %v240_v23  ;;  %v3805_v29 = vpack.c.bf16 %v259_v28, %v253_v27  ;;  %v252_v30 = vld [vmem:[#allocation4 + $0xc0] sm:$0xff]  ;;  %v258_v31 = vld [vmem:[#allocation4 + $0xf0] sm:$0xff]  ;;  %v265_v33 = vld [vmem:[#allocation4 + $0x128] sm:$0xff] }
  0x3e   :  { %403 = vmatprep.mubr.f32.mxu0 %v4210_v1  ;;  %3800 = vmatpush1.bf16.msra.mxu0 %v3799_v19  ;;  %v3807_v32 = vpack.c.bf16 %v258_v31, %v252_v30  ;;  %v271_v34 = vld [vmem:[#allocation4 + $0x158] sm:$0xff]  ;;  %v264_v35 = vld [vmem:[#allocation4 + $0x120] sm:$0xff]  ;;  %v270_v37 = vld [vmem:[#allocation4 + $0x150] sm:$0xff] }
  0x3f   :  { %3796 = vmatpush3.bf16.msra.mxu1 %v3795_v11  ;;  %3802 = vmatprep.subr.bf16.mxu0 %v3801_v25  ;;  %v3809_v36 = vpack.c.bf16 %v271_v34, %v265_v33  ;;  %v3811_v38 = vpack.c.bf16 %v270_v37, %v264_v35  ;;  %v277_v39 = vld [vmem:[#allocation4 + $0x188] sm:$0xff]  ;;  %v283_v40 = vld [vmem:[#allocation4 + $0x1b8] sm:$0xff]  ;;  %v276_v41 = vld [vmem:[#allocation4 + $0x180] sm:$0xff] }
  0x40   :  { %3822 = vmatprep.subr.bf16.mxu1 %v3821_v20  ;;  %v3813_v42 = vpack.c.bf16 %v283_v40, %v277_v39  ;;  %v282_v43 = vld [vmem:[#allocation4 + $0x1b0] sm:$0xff]  ;;  %v3241_v45 = vld [vmem:[%s4737_s1 + $0x10] ss:$0 sm:$0xff]  ;;  %v243_v49 = vld [vmem:[#allocation4 + $0x78] sm:$0xff] }
  0x41   :  { %v3815_v44 = vpack.c.bf16 %v282_v43, %v276_v41  ;;  %v230_v46 = vld [vmem:[#allocation4 + $0x10] sm:$0xff]  ;;  %v236_v47 = vld [vmem:[#allocation4 + $0x40] sm:$0xff]  ;;  %v249_v50 = vld [vmem:[#allocation4 + $0xa8] sm:$0xff] }
  0x42   :  { %3804 = vmatpush1.bf16.msra.mxu0 %v3803_v26  ;;  %v3823_v53 = vpack.c.bf16 %v236_v47, %v230_v46  ;;  %v3825_v55 = vpack.c.bf16 %v249_v50, %v243_v49  ;;  %v242_v56 = vld [vmem:[#allocation4 + $0x70] sm:$0xff]  ;;  %v248_v57 = vld [vmem:[#allocation4 + $0xa0] sm:$0xff]  ;;  %v255_v58 = vld [vmem:[#allocation4 + $0xd8] sm:$0xff] }
  0x43   :  { %3806 = vmatprep.subr.bf16.mxu0 %v3805_v29  ;;  %v261_v59 = vld [vmem:[#allocation4 + $0x108] sm:$0xff]  ;;  %v3827_v60 = vpack.c.bf16 %v248_v57, %v242_v56  ;;  %v254_v62 = vld [vmem:[#allocation4 + $0xd0] sm:$0xff]  ;;  %v260_v63 = vld [vmem:[#allocation4 + $0x100] sm:$0xff] }
  0x44   :  { %v3829_v61 = vpack.c.bf16 %v261_v59, %v255_v58  ;;  %v267_v2 = vld [vmem:[#allocation4 + $0x138] sm:$0xff]  ;;  %v273_v3 = vld [vmem:[#allocation4 + $0x168] sm:$0xff]  ;;  %v3831_v4 = vpack.c.bf16 %v260_v63, %v254_v62  ;;  %v266_v6 = vld [vmem:[#allocation4 + $0x130] sm:$0xff] }
  0x45   :  { %v3833_v5 = vpack.c.bf16 %v273_v3, %v267_v2  ;;  %v272_v7 = vld [vmem:[#allocation4 + $0x160] sm:$0xff]  ;;  %v279_v8 = vld [vmem:[#allocation4 + $0x198] sm:$0xff]  ;;  %v285_v9 = vld [vmem:[#allocation4 + $0x1c8] sm:$0xff] }
  0x46   :  { %3808 = vmatpush1.bf16.msra.mxu0 %v3807_v32  ;;  %v3835_v10 = vpack.c.bf16 %v272_v7, %v266_v6  ;;  %v3837_v11 = vpack.c.bf16 %v285_v9, %v279_v8  ;;  %v278_v12 = vld [vmem:[#allocation4 + $0x190] sm:$0xff]  ;;  %v284_v13 = vld [vmem:[#allocation4 + $0x1c0] sm:$0xff]  ;;  %v289_v15 = vld [vmem:[#allocation4 + $0x1e8] sm:$0xff]  ;;  %v305_v6 = vlaneseq }
  0x47   :  { %3810 = vmatprep.subr.bf16.mxu0 %v3809_v36  ;;  %v3839_v14 = vpack.c.bf16 %v284_v13, %v278_v12  ;;  %v295_v16 = vld [vmem:[#allocation4 + $0x218] sm:$0xff]  ;;  %v288_v18 = vld [vmem:[#allocation4 + $0x1e0] sm:$0xff]  ;;  %v294_v19 = vld [vmem:[#allocation4 + $0x210] sm:$0xff] }
  0x48   :  { %v3817_v17 = vpack.c.bf16 %v295_v16, %v289_v15  ;;  %v291_v20 = vld [vmem:[#allocation4 + $0x1f8] sm:$0xff]  ;;  %v3819_v21 = vpack.c.bf16 %v294_v19, %v288_v18  ;;  %v297_v22 = vld [vmem:[#allocation4 + $0x228] sm:$0xff]  ;;  %v290_v23 = vld [vmem:[#allocation4 + $0x1f0] sm:$0xff]  ;;  %v4312_v7 = vshrl.u32 %v305_v6, 7 }
  0x49   :  { %v296_v24 = vld [vmem:[#allocation4 + $0x220] sm:$0xff]  ;;  %v3841_v25 = vpack.c.bf16 %v297_v22, %v291_v20  ;;  %v233_v27 = vld [vmem:[#allocation4 + $0x28] sm:$0xff]  ;;  %v239_v28 = vld [vmem:[#allocation4 + $0x58] sm:$0xff] }
  0x4a   :  { %3812 = vmatpush1.bf16.msra.mxu0 %v3811_v38  ;;  %v3843_v26 = vpack.c.bf16 %v296_v24, %v290_v23  ;;  %v3845_v29 = vpack.c.bf16 %v239_v28, %v233_v27  ;;  %v3243_v30 = vld [vmem:[#allocation2 + $0x20] ss:$0 sm:$0xff]  ;;  %v232_v31 = vld [vmem:[#allocation4 + $0x20] sm:$0xff]  ;;  %v245_v34 = vld [vmem:[#allocation4 + $0x88] sm:$0xff] }
  0x4b   :  { %3814 = vmatprep.subr.bf16.mxu0 %v3813_v42  ;;  %v238_v32 = vld [vmem:[#allocation4 + $0x50] sm:$0xff]  ;;  %v251_v35 = vld [vmem:[#allocation4 + $0xb8] sm:$0xff]  ;;  %v244_v41 = vld [vmem:[#allocation4 + $0x80] sm:$0xff] }
  0x4c   :  { %v3847_v38 = vpack.c.bf16 %v238_v32, %v232_v31  ;;  %v3849_v40 = vpack.c.bf16 %v251_v35, %v245_v34  ;;  %v250_v42 = vld [vmem:[#allocation4 + $0xb0] sm:$0xff]  ;;  %v257_v43 = vld [vmem:[#allocation4 + $0xe8] sm:$0xff]  ;;  %v256_v47 = vld [vmem:[#allocation4 + $0xe0] sm:$0xff] }
  0x4d   :  { %v269_v49 = vld [vmem:[#allocation4 + $0x148] sm:$0xff]  ;;  %v275_v50 = vld [vmem:[#allocation4 + $0x178] sm:$0xff]  ;;  %v280_v59 = vld [vmem:[#allocation4 + $0x1a0] sm:$0xff] }
  0x4e   :  { %3816 = vmatpush1.bf16.msra.mxu0 %v3815_v44  ;;  %v263_v44 = vld [vmem:[#allocation4 + $0x118] sm:$0xff]  ;;  %v292_v3 = vld [vmem:[#allocation4 + $0x200] sm:$0xff]  ;;  %v559_v32 = vld [vmem:[#allocation2 + $0x60] sm:$0xff] }
  0x4f   :  { %3818 = vmatprep.subr.bf16.mxu0 %v3817_v17  ;;  %v3853_v46 = vpack.c.bf16 %v263_v44, %v257_v43  ;;  %v287_v56 = vld [vmem:[#allocation4 + $0x1d8] sm:$0xff]  ;;  %v302_v9 = vld [vmem:[#allocation4 + $0x240] ss:$8 sm:$0x30] }
  0x50   :  { %v299_v62 = vld [vmem:[#allocation4 + $0x238] sm:$0xff] }
  0x51   :  { %v301_v8 = vld [vmem:[#allocation4 + $0x240] ss:$8 sm:$0xf] }
  0x52   :  { %3820 = vmatpush1.bf16.msra.mxu0 %v3819_v21  ;;  %v3248_v21 = vld [vmem:[%s4737_s1 + $0x18] ss:$0 sm:$0xff]  ;;  %v556_v28 = vld [vmem:[#allocation2 + $0x48] sm:$0xff] }
  0x53   :  { %3846 = vmatprep.subr.bf16.mxu0 %v3845_v29  ;;  %v557_v29 = vld [vmem:[#allocation2 + $0x50] sm:$0xff] }
  0x54   :  { %v4336_v31 = vpack.c.bf16 %v557_v29, %v556_v28 }
 0x110   :  { %v139_v48 = vpop.f32.mrb[0].mxu0 }
 0x111   :  { %v140_v51 = vadd.f32 %v3241_v45, %v139_v48  ;;  %v3446_v52 = vpop.f32.mrb[1].mxu0  ;;  %v3851_v45 = vpack.c.bf16 %v250_v42, %v244_v41  ;;  %v262_v48 = vld [vmem:[#allocation4 + $0x110] sm:$0xff]  ;;  %v554_v41 = vld [vmem:[#allocation2 + $0x38] sm:$0xff] }
 0x112   :  { %v3857_v52 = vpack.c.bf16 %v275_v50, %v269_v49  ;;  %v555_v42 = vld [vmem:[#allocation2 + $0x40] sm:$0xff] }
 0x113   :  { %v143_v54 = vmax.f32 %v140_v51, 0.0  ;;  %v3855_v51 = vpack.c.bf16 %v262_v48, %v256_v47  ;;  %v4354_v44 = vpack.c.bf16 %v555_v42, %v554_v41 }
 0x115   :  { %3456 = vmatmul.mubr.msk.f32.vlgmr.msra.gmra.mrb[0].mxu1 %vm153_vm2, %v143_v54  ;;  %v274_v54 = vld [vmem:[#allocation4 + $0x170] sm:$0xff] }
 0x116   :  { %3824 = vmatpush1.bf16.msra.mxu1 %v3823_v53  ;;  %474 = vmatprep.mubr.f32.mxu1 %v4210_v1  ;;  %v268_v53 = vld [vmem:[#allocation4 + $0x140] sm:$0xff] }
 0x117   :  { %3826 = vmatprep.subr.bf16.mxu1 %v3825_v55  ;;  %v281_v55 = vld [vmem:[#allocation4 + $0x1a8] sm:$0xff]  ;;  %v3859_v57 = vpack.c.bf16 %v274_v54, %v268_v53  ;;  %v3251_v54 = vld [vmem:[%s4737_s1 + $0x20] ss:$0 sm:$0xff] }
 0x118   :  { %v3861_v58 = vpack.c.bf16 %v287_v56, %v281_v55 }
 0x11a   :  { %3828 = vmatpush1.bf16.msra.mxu1 %v3827_v60  ;;  %v286_v60 = vld [vmem:[#allocation4 + $0x1d0] sm:$0xff] }
 0x11b   :  { %3830 = vmatprep.subr.bf16.mxu1 %v3829_v61  ;;  %v293_v61 = vld [vmem:[#allocation4 + $0x208] sm:$0xff]  ;;  %v3863_v63 = vpack.c.bf16 %v286_v60, %v280_v59 }
 0x11c   :  { %v3865_v2 = vpack.c.bf16 %v299_v62, %v293_v61 }
 0x11e   :  { %3832 = vmatpush1.bf16.msra.mxu1 %v3831_v4  ;;  %v298_v4 = vld [vmem:[#allocation4 + $0x230] sm:$0xff] }
 0x11f   :  { %3834 = vmatprep.subr.bf16.mxu1 %v3833_v5  ;;  %v3867_v5 = vpack.c.bf16 %v298_v4, %v292_v3 }
 0x122   :  { %3836 = vmatpush1.bf16.msra.mxu1 %v3835_v10  ;;  %v4314_v10 = vor.u32 %v302_v9, %v301_v8  ;;  %v560_v8 = vld [vmem:[#allocation2 + $0x68] sm:$0xff]  ;;  %v561_v9 = vld [vmem:[#allocation2 + $0x70] sm:$0xff] }
 0x123   :  { %3838 = vmatprep.subr.bf16.mxu1 %v3837_v11  ;;  %v307_v11 = vsub.s32 0, %v4312_v7 }
 0x125   :  { %v308_v12 = vrot.slane %v4314_v10, %v307_v11  ;;  %v562_v11 = vld [vmem:[#allocation2 + $0x78] sm:$0xff] }
 0x126   :  { %3840 = vmatpush1.bf16.msra.mxu1 %v3839_v14 }
 0x127   :  { %3842 = vmatprep.subr.bf16.mxu1 %v3841_v25 }
 0x12a   :  { %3844 = vmatpush1.bf16.msra.mxu1 %v3843_v26 }
 0x12b   :  { %3869 = vmatprep.subr.bf16.mxu1 %v4208_v0 }
 0x1e8   :  { %v223_v33 = vpop.f32.mrb[0].mxu1 }
 0x1e9   :  { %v224_v36 = vadd.f32 %v3243_v30, %v223_v33  ;;  %v3457_v37 = vpop.f32.mrb[1].mxu1  ;;  %v558_v30 = vld [vmem:[#allocation2 + $0x58] sm:$0xff] }
 0x1ea   :  { %v4339_v33 = vpack.c.bf16 %v559_v32, %v558_v30 }
 0x1eb   :  { %v227_v39 = vmax.f32 %v224_v36, 0.0 }
 0x1ed   :  { %3245 = vmatmul.mubr.msk.f32.vlgmr.msra.gmra.mrb[2].mxu0 %vm335_vm3, %v227_v39  ;;  %3246 = vmatmul.mubr.msk.f32.vlgmr.msra.gmra.mrb[2].mxu1 %vm335_vm3, %v227_v39 }
 0x1ee   :  { %3848 = vmatpush1.bf16.msra.mxu0 %v3847_v38  ;;  %545 = vmatprep.mubr.f32.mxu0 %v4210_v1  ;;  %v552_v38 = vld [vmem:[#allocation2 + $0x28] sm:$0xff] }
 0x1ef   :  { %3850 = vmatprep.subr.bf16.mxu0 %v3849_v40  ;;  %3466 = vmatprep.mubr.msk.f32.mxu1 %vm4209_vm0, %v4210_v1 }
 0x1f0   :  { %3871 = vmatpush3.bf16.msra.mxu1 %v4336_v31 }
 0x1f1   :  { %3872 = vmatprep.subr.bf16.mxu1 %v4208_v0 }
 0x1f2   :  { %3852 = vmatpush1.bf16.msra.mxu0 %v3851_v45  ;;  %v4369_v45 = vld [vmem:[#allocation2 + $0x88] ss:$0 sm:$0xff] }
 0x1f3   :  { %3854 = vmatprep.subr.bf16.mxu0 %v3853_v46 }
 0x1f4   :  { %3874 = vmatpush3.bf16.msra.mxu1 %v4339_v33 }
 0x1f5   :  { %3875 = vmatprep.subr.bf16.mxu1 %v4208_v0 }
 0x1f6   :  { %3856 = vmatpush1.bf16.msra.mxu0 %v3855_v51 }
 0x1f7   :  { %3858 = vmatprep.subr.bf16.mxu0 %v3857_v52 }
 0x1fa   :  { %3860 = vmatpush1.bf16.msra.mxu0 %v3859_v57 }
 0x1fb   :  { %3862 = vmatprep.subr.bf16.mxu0 %v3861_v58 }
 0x1fe   :  { %3864 = vmatpush1.bf16.msra.mxu0 %v3863_v63 }
 0x1ff   :  { %3866 = vmatprep.subr.bf16.mxu0 %v3865_v2 }
 0x202   :  { %3868 = vmatpush1.bf16.msra.mxu0 %v3867_v5 }
 0x203   :  { %3887 = vmatprep.subr.bf16.mxu0 %v4208_v0 }
 0x205   :  { %3247 = vmatmul.mubr.msk.f32.vlgmr.msra.gmra.mrb[4].mxu0 %vm335_vm3, %v227_v39  ;;  %v553_v39 = vld [vmem:[#allocation2 + $0x30] sm:$0xff] }
 0x206   :  { %3499 = vmatprep.mubr.msk.f32.mxu0 %vm4209_vm0, %v4210_v1  ;;  %v4347_v40 = vpack.c.bf16 %v553_v39, %v552_v38  ;;  %v690_v38 = vld [vmem:[#allocation6 + $0x10] sm:$0xff]  ;;  %v691_v39 = vld [vmem:[#allocation6 + $0x18] sm:$0xff] }
 0x2c0   :  { %v405_v13 = vpop.f32.mrb[2].mxu0  ;;  %v4318_v14 = vpop.f32.mrb[2].mxu1 }
 0x2c1   :  { %v4320_v15 = vadd.f32 %v405_v13, %v308_v12  ;;  %v4322_v16 = vpop.f32.mrb[3].mxu0  ;;  %v4324_v17 = vpop.f32.mrb[3].mxu1  ;;  %v4383_v12 = vpack.c.bf16 %v561_v9, %v560_v8  ;;  %v563_v13 = vld [vmem:[#allocation2 + $0x80] sm:$0xff] }
 0x2c2   :  { %v978_v9 = vld [vmem:[#allocation6 + $0x20] sm:$0xff] }
 0x2c3   :  { %v567_v18 = vmul.f32 0.5, %v4320_v15  ;;  %3889 = vmatpush3.bf16.msra.mxu0 %v4383_v12 }
 0x2c4   :  { %3890 = vmatprep.subr.bf16.mxu0 %v4208_v0 }
 0x2c5   :  { %4062 = vtanh.f32 %v567_v18 }
 0x2cf   :  { %v4063_v19 = vpop.eup %4062 }
 0x2d0   :  { %v569_v20 = vmul.f32 0.5, %v4063_v19  ;;  %v311_v19 = vsub.s32 1, %v4312_v7 }
 0x2d2   :  { %v570_v22 = vadd.f32 0.5, %v569_v20  ;;  %v312_v20 = vrot.slane %v4314_v10, %v311_v19  ;;  %v981_v19 = vld [vmem:[#allocation6 + $0x38] sm:$0xff] }
 0x2d4   :  { %v575_v23 = vmul.f32 %v3248_v21, %v570_v22  ;;  %v582_v35 = vsub.f32 1.0, %v570_v22 }
 0x2d6   :  { %577 = vrot.lane.b32.xlu0 %v575_v23, %s4211_s14 }
 0x2d8   :  { %v4331_v24 = vpop.f32.mrb[4].mxu0 }
 0x2d9   :  { %v4333_v25 = vpop.f32.mrb[5].mxu0 }
 0x348   :  { %v578_v26 = vpop.permute.xlu0 %577 }
 0x349   :  { %v580_v27 = vadd.f32 %v578_v26, %v4320_v15 }
 0x34b   :  { %4064 = vtanh.f32 %v580_v27 }
 0x355   :  { %v4065_v34 = vpop.eup %4064 }
 0x356   :  { %584 = vrot.lane.b32.xlu0 %v4065_v34, %s4212_s15  ;;  %v688_v34 = vld [vmem:[#allocation6] sm:$0xff] }
 0x3c8   :  { %v585_v36 = vpop.permute.xlu0 %584 }
 0x3c9   :  { %v587_v37 = vmul.f32 %v585_v36, %v582_v35  ;;  %v689_v35 = vld [vmem:[#allocation6 + $0x8] sm:$0xff] }
 0x3cb   :  { %593 = vrot.lane.b32.xlu1 %v587_v37, %s4212_s15  ;;  %v3900_v37 = vpack.c.bf16 %v689_v35, %v688_v34 }
 0x3cf   :  { %777 = vrot.lane.b32.xlu1 %v3248_v21, %s4211_s14  ;;  %v4395_v21 = vadd.f32 %v4322_v16, %v312_v20 }
 0x43d   :  { %v4349_v43 = vpop.permute.xlu1 %593 }
 0x43e   :  { %3467 = vmatmul.mubr.msk.f32.vlgmr.msra.gmra.mrb[4].mxu1 %vm153_vm2, %v4349_v43 }
 0x43f   :  { %3877 = vmatpush3.bf16.msra.mxu1 %v4347_v40  ;;  %3477 = vmatprep.mubr.msk.f32.mxu1 %vm4209_vm0, %v4210_v1 }
 0x440   :  { %3878 = vmatprep.subr.bf16.mxu1 %v4208_v0 }
 0x441   :  { %v4376_v57 = vpop.permute.xlu1 %777 }
 0x443   :  { %3880 = vmatpush3.bf16.msra.mxu1 %v4354_v44 }
 0x444   :  { %3881 = vmatprep.subr.bf16.mxu1 %v4208_v0 }
 0x446   :  { %3478 = vmatmul.mubr.msk.f32.vlgmr.msra.gmra.mrb[6].mxu1 %vm153_vm2, %v4349_v43 }
 0x447   :  { %3883 = vmatpush3.bf16.msra.mxu1 %v4336_v31  ;;  %3488 = vmatprep.mubr.msk.f32.mxu1 %vm4209_vm0, %v4210_v1 }
 0x448   :  { %3884 = vmatprep.subr.bf16.mxu1 %v4208_v0 }
 0x44b   :  { %3886 = vmatpush3.bf16.msra.mxu1 %v4339_v33 }
 0x44c   :  { %3893 = vmatprep.subr.bf16.mxu1 %v4208_v0 }
 0x511   :  { %v663_v46 = vpop.f32.mrb[4].mxu1 }
 0x512   :  { %v664_v47 = vadd.f32 %v4369_v45, %v663_v46  ;;  %v3468_v48 = vpop.f32.mrb[5].mxu1  ;;  %v3903_v46 = vpack.c.bf16 %v691_v39, %v690_v38 }
 0x514   :  { %v667_v49 = vmul.f32 0.5, %v664_v47 }
 0x516   :  { %4066 = vtanh.f32 %v667_v49 }
 0x519   :  { %v758_v50 = vpop.f32.mrb[6].mxu1 }
 0x51a   :  { %763 = vrot.lane.b32.xlu1 %v758_v50, %s4212_s15  ;;  %v3479_v51 = vpop.f32.mrb[7].mxu1  ;;  %v780_v58 = vadd.f32 %v4376_v57, %v758_v50 }
 0x520   :  { %v4067_v52 = vpop.eup %4066 }
 0x521   :  { %v669_v53 = vmul.f32 0.5, %v4067_v52 }
 0x523   :  { %v670_v55 = vadd.f32 0.5, %v669_v53 }
 0x525   :  { %v675_v56 = vmul.f32 %v3251_v54, %v670_v55  ;;  %v682_v26 = vsub.f32 1.0, %v670_v55 }
 0x527   :  { %677 = vrot.lane.b32.xlu0 %v675_v56, %s4211_s14 }
 0x52b   :  { %782 = vrot.lane.b32.xlu0 %v780_v58, %s4213_s17 }
 0x58c   :  { %v764_v59 = vpop.permute.xlu1 %763 }
 0x58d   :  { %v766_v60 = vadd.f32 %v764_v59, %v4320_v15  ;;  %v4386_v15 = vpack.c.bf16 %v563_v13, %v562_v11  ;;  %v767_v30 = vadd.f32 %v764_v59, %v4395_v21  ;;  %v979_v11 = vld [vmem:[#allocation6 + $0x28] sm:$0xff]  ;;  %v980_v13 = vld [vmem:[#allocation6 + $0x30] sm:$0xff] }
 0x58e   :  { %v3897_v20 = vpack.c.bf16 %v981_v19, %v980_v13 }
 0x58f   :  { %v768_v61 = vmul.f32 0.5, %v766_v60  ;;  %3892 = vmatpush3.bf16.msra.mxu0 %v4386_v15  ;;  %v769_v16 = vmul.f32 0.5, %v767_v30 }
 0x590   :  { %3899 = vmatprep.subr.bf16.mxu0 %v4208_v0 }
 0x591   :  { %4068 = vtanh.f32 %v768_v61 }
 0x599   :  { %v678_v62 = vpop.permute.xlu0 %677 }
 0x59a   :  { %v680_v63 = vadd.f32 %v678_v62, %v664_v47 }
 0x59b   :  { %v4069_v2 = vpop.eup %4068 }
 0x59c   :  { %4070 = vtanh.f32 %v680_v63  ;;  %v772_v3 = vmul.f32 0.5, %v4069_v2 }
 0x59d   :  { %v783_v4 = vpop.permute.xlu0 %782 }
 0x59e   :  { %v774_v5 = vadd.f32 0.5, %v772_v3 }
 0x5a0   :  { %v785_v6 = vmul.f32 %v783_v4, %v774_v5 }
 0x5a2   :  { %787 = vrot.lane.b32.xlu0 %v785_v6, %s4211_s14 }
 0x5a6   :  { %v4071_v18 = vpop.eup %4070 }
 0x5a7   :  { %684 = vrot.lane.b32.xlu1 %v4071_v18, %s4212_s15  ;;  %v3894_v18 = vpack.c.bf16 %v979_v11, %v978_v9 }
 0x614   :  { %v788_v22 = vpop.permute.xlu0 %787 }
 0x615   :  { %v790_v23 = vadd.f32 %v788_v22, %v4395_v21 }
 0x617   :  { %4072 = vtanh.f32 %v790_v23 }
 0x618   :  { %4074 = vtanh.f32 %v769_v16 }
 0x619   :  { %v685_v27 = vpop.permute.xlu1 %684 }
 0x61a   :  { %v4398_v28 = vmul.f32 %v685_v27, %v682_v26 }
 0x61c   :  { %875 = vrot.lane.b32.xlu1 %v4398_v28, %s4212_s15 }
 0x620   :  { %955 = vrot.lane.b32.xlu1 %v3251_v54, %s4211_s14 }
 0x621   :  { %v4073_v29 = vpop.eup %4072 }
 0x622   :  { %794 = vrot.lane.b32.xlu0 %v4073_v29, %s4212_s15  ;;  %v4075_v32 = vpop.eup %4074 }
 0x623   :  { %v773_v36 = vmul.f32 0.5, %v4075_v32 }
 0x625   :  { %v775_v42 = vadd.f32 0.5, %v773_v36 }
 0x627   :  { %v792_v47 = vsub.f32 1.0, %v775_v42  ;;  %v799_v49 = vmul.f32 %v775_v42, %v4349_v43 }
 0x68e   :  { %v876_v41 = vpop.permute.xlu1 %875 }
 0x68f   :  { %3500 = vmatmul.mubr.msk.f32.vlgmr.msra.gmra.mrb[6].mxu0 %vm153_vm2, %v876_v41 }
 0x690   :  { %3901 = vmatpush3.bf16.msra.mxu0 %v3900_v37  ;;  %3521 = vmatprep.mubr.msk.f32.mxu0 %vm4209_vm0, %v4210_v1 }
 0x691   :  { %3902 = vmatprep.subr.bf16.mxu0 %v4208_v0 }
 0x692   :  { %v4424_v43 = vpop.permute.xlu1 %955 }
 0x694   :  { %v795_v48 = vpop.permute.xlu0 %794  ;;  %3904 = vmatpush3.bf16.msra.mxu0 %v3903_v46 }
 0x695   :  { %v797_v50 = vmul.f32 %v795_v48, %v792_v47  ;;  %3911 = vmatprep.subr.bf16.mxu0 %v4208_v0 }
 0x697   :  { %v4411_v51 = vadd.f32 %v799_v49, %v797_v50  ;;  %3522 = vmatmul.mubr.msk.f32.vlgmr.msra.gmra.mrb[8].mxu0 %vm153_vm2, %v876_v41 }
 0x698   :  { %3913 = vmatpush3.bf16.msra.mxu0 %v4336_v31  ;;  %3543 = vmatprep.mubr.msk.f32.mxu0 %vm4209_vm0, %v4210_v1 }
 0x699   :  { %3489 = vmatmul.mubr.msk.f32.vlgmr.msra.gmra.mrb[8].mxu1 %vm153_vm2, %v4411_v51  ;;  %3914 = vmatprep.subr.bf16.mxu0 %v4208_v0 }
 0x69a   :  { %3510 = vmatprep.mubr.msk.f32.mxu1 %vm4209_vm0, %v4210_v1  ;;  %3895 = vmatpush3.bf16.msra.mxu1 %v3894_v18 }
 0x69b   :  { %3896 = vmatprep.subr.bf16.mxu1 %v4208_v0 }
 0x69c   :  { %3916 = vmatpush3.bf16.msra.mxu0 %v4339_v33 }
 0x69d   :  { %3923 = vmatprep.subr.bf16.mxu0 %v4208_v0 }
 0x69e   :  { %3898 = vmatpush3.bf16.msra.mxu1 %v3897_v20 }
 0x69f   :  { %3905 = vmatprep.subr.bf16.mxu1 %v4208_v0 }
 0x762   :  { %v945_v52 = vpop.f32.mrb[6].mxu0 }
 0x763   :  { %v3501_v53 = vpop.f32.mrb[7].mxu0  ;;  %v958_v54 = vadd.f32 %v4424_v43, %v945_v52 }
 0x764   :  { %v315_v53 = vsub.s32 2, %v4312_v7 }
 0x765   :  { %960 = vrot.lane.b32.xlu0 %v958_v54, %s4211_s14 }
 0x76a   :  { %v1123_v55 = vpop.f32.mrb[8].mxu0 }
 0x76b   :  { %v3523_v56 = vpop.f32.mrb[9].mxu0 }
 0x76c   :  { %v870_v58 = vpop.f32.mrb[8].mxu1 }
 0x76d   :  { %v3490_v59 = vpop.f32.mrb[9].mxu1  ;;  %v871_v60 = vadd.f32 %v4369_v45, %v870_v58 }
 0x76f   :  { %v949_v61 = vadd.f32 %v945_v52, %v871_v60 }
 0x771   :  { %v950_v62 = vmul.f32 0.5, %v949_v61 }
 0x773   :  { %4076 = vtanh.f32 %v950_v62 }
 0x77d   :  { %v4077_v63 = vpop.eup %4076 }
 0x77e   :  { %v952_v2 = vmul.f32 0.5, %v4077_v63 }
 0x780   :  { %v953_v3 = vadd.f32 0.5, %v952_v2 }
 0x782   :  { %v970_v23 = vsub.f32 1.0, %v953_v3  ;;  %v976_v27 = vmul.f32 %v953_v3, %v4398_v28 }
 0x7d7   :  { %v961_v4 = vpop.permute.xlu0 %960 }
 0x7d8   :  { %v963_v5 = vmul.f32 %v961_v4, %v953_v3 }
 0x7da   :  { %965 = vrot.lane.b32.xlu1 %v963_v5, %s4211_s14 }
 0x84c   :  { %v966_v6 = vpop.permute.xlu1 %965 }
 0x84d   :  { %v968_v8 = vadd.f32 %v966_v6, %v871_v60 }
 0x84f   :  { %4078 = vtanh.f32 %v968_v8 }
 0x859   :  { %v4079_v22 = vpop.eup %4078 }
 0x85a   :  { %972 = vrot.lane.b32.xlu0 %v4079_v22, %s4212_s15 }
 0x8cc   :  { %v973_v26 = vpop.permute.xlu0 %972 }
 0x8cd   :  { %v975_v29 = vmul.f32 %v973_v26, %v970_v23 }
 0x8cf   :  { %v4434_v30 = vadd.f32 %v976_v27, %v975_v29 }
 0x8d1   :  { %983 = vrot.lane.b32.xlu1 %v4434_v30, %s4212_s15 }
 0x943   :  { %v984_v16 = vpop.permute.xlu1 %983 }
 0x944   :  { %3511 = vmatmul.mubr.msk.f32.vlgmr.msra.gmra.mrb[10].mxu1 %vm153_vm2, %v984_v16 }
 0x945   :  { %3907 = vmatpush3.bf16.msra.mxu1 %v4347_v40  ;;  %3532 = vmatprep.mubr.msk.f32.mxu1 %vm4209_vm0, %v4210_v1 }
 0x946   :  { %3908 = vmatprep.subr.bf16.mxu1 %v4208_v0 }
 0x949   :  { %3910 = vmatpush3.bf16.msra.mxu1 %v4354_v44 }
 0x94a   :  { %3917 = vmatprep.subr.bf16.mxu1 %v4208_v0 }
 0x94c   :  { %3533 = vmatmul.mubr.msk.f32.vlgmr.msra.gmra.mrb[12].mxu1 %vm153_vm2, %v4411_v51 }
 0x94d   :  { %3919 = vmatpush3.bf16.msra.mxu1 %v4383_v12  ;;  %3554 = vmatprep.mubr.msk.f32.mxu1 %vm4209_vm0, %v4210_v1 }
 0x94e   :  { %3920 = vmatprep.subr.bf16.mxu1 %v4208_v0 }
 0x951   :  { %3922 = vmatpush3.bf16.msra.mxu1 %v4386_v15 }
 0x952   :  { %3929 = vmatprep.subr.bf16.mxu1 %v4208_v0 }
 0x954   :  { %3555 = vmatmul.mubr.msk.f32.vlgmr.msra.gmra.mrb[14].mxu1 %vm153_vm2, %v984_v16 }
 0x955   :  { %3931 = vmatpush3.bf16.msra.mxu1 %v4347_v40  ;;  %3576 = vmatprep.mubr.msk.f32.mxu1 %vm4209_vm0, %v4210_v1 }
 0x956   :  { %3932 = vmatprep.subr.bf16.mxu1 %v4208_v0 }
 0x959   :  { %3934 = vmatpush3.bf16.msra.mxu1 %v4354_v44 }
 0x95a   :  { %3941 = vmatprep.subr.bf16.mxu1 %v4208_v0 }
 0xa17   :  { %v1053_v28 = vpop.f32.mrb[10].mxu1 }
 0xa18   :  { %v4460_v32 = vadd.f32 %v1123_v55, %v1053_v28  ;;  %v3512_v34 = vpop.f32.mrb[11].mxu1 }
 0xa1f   :  { %v1193_v35 = vpop.f32.mrb[12].mxu1 }
 0xa20   :  { %1198 = vrot.lane.b32.xlu0 %v1193_v35, %s4211_s14  ;;  %v3534_v36 = vpop.f32.mrb[13].mxu1  ;;  %v1206_v48 = vadd.f32 %v1193_v35, %v4376_v57 }
 0xa27   :  { %v1366_v37 = vpop.f32.mrb[14].mxu1 }
 0xa28   :  { %v3556_v38 = vpop.f32.mrb[15].mxu1  ;;  %v1375_v52 = vadd.f32 %v1366_v37, %v4424_v43 }
 0xa29   :  { %v1395_v38 = vld [vmem:[#allocation6 + $0x40] sm:$0xff] }
 0xa92   :  { %v1199_v39 = vpop.permute.xlu0 %1198 }
 0xa93   :  { %v1201_v41 = vadd.f32 %v1199_v39, %v4395_v21  ;;  %v316_v21 = vrot.slane %v4314_v10, %v315_v53  ;;  %v1396_v39 = vld [vmem:[#allocation6 + $0x48] sm:$0xff] }
 0xa95   :  { %v1202_v42 = vmul.f32 0.5, %v1201_v41  ;;  %v477_v54 = vadd.f32 %v4318_v14, %v316_v21  ;;  %v3924_v41 = vpack.c.bf16 %v1396_v39, %v1395_v38 }
 0xa97   :  { %4080 = vtanh.f32 %v1202_v42 }
 0xaa1   :  { %v4081_v46 = vpop.eup %4080 }
 0xaa2   :  { %v1204_v47 = vmul.f32 0.5, %v4081_v46 }
 0xaa4   :  { %v1205_v49 = vadd.f32 0.5, %v1204_v47 }
 0xaa6   :  { %v1207_v50 = vmul.f32 %v1206_v48, %v1205_v49  ;;  %v1214_v60 = vsub.f32 1.0, %v1205_v49  ;;  %v1397_v48 = vld [vmem:[#allocation6 + $0x50] sm:$0xff] }
 0xaa8   :  { %1209 = vrot.lane.b32.xlu1 %v1207_v50, %s4211_s14 }
 0xaac   :  { %1220 = vrot.lane.b32.xlu1 %v4411_v51, %s4212_s15 }
 0xab0   :  { %1377 = vrot.lane.b32.xlu1 %v1375_v52, %s4211_s14 }
 0xb1a   :  { %v1210_v55 = vpop.permute.xlu1 %1209 }
 0xb1b   :  { %v1212_v56 = vadd.f32 %v1210_v55, %v477_v54 }
 0xb1d   :  { %4082 = vtanh.f32 %v1212_v56 }
 0xb1e   :  { %v1221_v59 = vpop.permute.xlu1 %1220 }
 0xb1f   :  { %v1223_v51 = vmul.f32 %v1221_v59, %v1205_v49  ;;  %v1398_v49 = vld [vmem:[#allocation6 + $0x58] sm:$0xff] }
 0xb20   :  { %v3927_v50 = vpack.c.bf16 %v1398_v49, %v1397_v48 }
 0xb22   :  { %v1378_v20 = vpop.permute.xlu1 %1377 }
 0xb27   :  { %v4083_v58 = vpop.eup %4082 }
 0xb28   :  { %1216 = vrot.lane.b32.xlu0 %v4083_v58, %s4212_s15 }
 0xb9a   :  { %v1217_v61 = vpop.permute.xlu0 %1216 }
 0xb9b   :  { %v1219_v62 = vmul.f32 %v1217_v61, %v1214_v60 }
 0xb9d   :  { %v1224_v63 = vadd.f32 %v1223_v51, %v1219_v62 }
 0xb9f   :  { %1226 = vrot.lane.b32.xlu0 %v1224_v63, %s4213_s17 }
 0xc11   :  { %v1227_v2 = vpop.permute.xlu0 %1226 }
 0xc12   :  { %3544 = vmatmul.mubr.msk.f32.vlgmr.msra.gmra.mrb[10].mxu0 %vm153_vm2, %v1227_v2  ;;  %3577 = vmatmul.mubr.msk.f32.vlgmr.msra.gmra.mrb[16].mxu1 %vm153_vm2, %v1227_v2 }
 0xc13   :  { %3943 = vmatpush3.bf16.msra.mxu1 %v4383_v12  ;;  %3565 = vmatprep.mubr.msk.f32.mxu0 %vm4209_vm0, %v4210_v1 }
 0xc14   :  { %3944 = vmatprep.subr.bf16.mxu1 %v4208_v0  ;;  %3598 = vmatprep.mubr.msk.f32.mxu1 %vm4209_vm0, %v4210_v1 }
 0xc15   :  { %3925 = vmatpush3.bf16.msra.mxu0 %v3924_v41 }
 0xc16   :  { %3926 = vmatprep.subr.bf16.mxu0 %v4208_v0 }
 0xc17   :  { %3946 = vmatpush3.bf16.msra.mxu1 %v4386_v15 }
 0xc18   :  { %3953 = vmatprep.subr.bf16.mxu1 %v4208_v0 }
 0xc19   :  { %3928 = vmatpush3.bf16.msra.mxu0 %v3927_v50  ;;  %v1747_v50 = vld [vmem:[#allocation6 + $0x60] sm:$0xff] }
 0xc1a   :  { %3935 = vmatprep.subr.bf16.mxu0 %v4208_v0 }
 0xce5   :  { %v1296_v14 = vpop.f32.mrb[10].mxu0  ;;  %v1541_v3 = vpop.f32.mrb[16].mxu1 }
 0xce6   :  { %v1297_v4 = vadd.f32 %v4369_v45, %v1296_v14  ;;  %v1554_v5 = vadd.f32 %v1541_v3, %v4376_v57  ;;  %v3545_v6 = vpop.f32.mrb[11].mxu0  ;;  %1546 = vrot.lane.b32.xlu0 %v1541_v3, %s4213_s17  ;;  %v3578_v8 = vpop.f32.mrb[17].mxu1 }
 0xce8   :  { %v1370_v9 = vadd.f32 %v1366_v37, %v1297_v4  ;;  %1556 = vrot.lane.b32.xlu1 %v1554_v5, %s4212_s15 }
 0xcea   :  { %v1371_v11 = vmul.f32 0.5, %v1370_v9 }
 0xcec   :  { %4084 = vtanh.f32 %v1371_v11 }
 0xcf6   :  { %v4085_v13 = vpop.eup %4084 }
 0xcf7   :  { %v1373_v18 = vmul.f32 0.5, %v4085_v13 }
 0xcf9   :  { %v1374_v19 = vadd.f32 0.5, %v1373_v18 }
 0xcfb   :  { %v1380_v22 = vmul.f32 %v1378_v20, %v1374_v19  ;;  %v1387_v53 = vsub.f32 1.0, %v1374_v19  ;;  %v1393_v55 = vmul.f32 %v1374_v19, %v4434_v30 }
 0xcfd   :  { %1382 = vrot.lane.b32.xlu0 %v1380_v22, %s4211_s14 }
 0xd58   :  { %v1547_v23 = vpop.permute.xlu0 %1546 }
 0xd59   :  { %v1549_v26 = vadd.f32 %v1547_v23, %v477_v54 }
 0xd5a   :  { %v1557_v34 = vpop.permute.xlu1 %1556 }
 0xd5b   :  { %v1550_v27 = vmul.f32 0.5, %v1549_v26 }
 0xd5d   :  { %4086 = vtanh.f32 %v1550_v27 }
 0xd67   :  { %v4087_v29 = vpop.eup %4086 }
 0xd68   :  { %v1552_v16 = vmul.f32 0.5, %v4087_v29 }
 0xd6a   :  { %v1553_v28 = vadd.f32 0.5, %v1552_v16  ;;  %v319_v16 = vsub.s32 3, %v4312_v7 }
 0xd6c   :  { %v1559_v35 = vmul.f32 %v1557_v34, %v1553_v28  ;;  %v1566_v59 = vsub.f32 1.0, %v1553_v28 }
 0xd6e   :  { %1561 = vrot.lane.b32.xlu1 %v1559_v35, %s4211_s14 }
 0xd6f   :  { %v1383_v36 = vpop.permute.xlu0 %1382 }
 0xd70   :  { %v1385_v37 = vadd.f32 %v1383_v36, %v1297_v4 }
 0xd72   :  { %4088 = vtanh.f32 %v1385_v37 }
 0xd7c   :  { %v4089_v42 = vpop.eup %4088 }
 0xd7d   :  { %1389 = vrot.lane.b32.xlu0 %v4089_v42, %s4212_s15 }
 0xd81   :  { %1572 = vrot.lane.b32.xlu0 %v1224_v63, %s4212_s15 }
 0xde0   :  { %v1562_v46 = vpop.permute.xlu1 %1561 }
 0xde1   :  { %v1564_v47 = vadd.f32 %v1562_v46, %v477_v54 }
 0xde3   :  { %4090 = vtanh.f32 %v1564_v47 }
 0xded   :  { %v4091_v52 = vpop.eup %4090 }
 0xdee   :  { %1568 = vrot.lane.b32.xlu1 %v4091_v52, %s4212_s15  ;;  %v1748_v52 = vld [vmem:[#allocation6 + $0x68] sm:$0xff] }
 0xdef   :  { %v1390_v21 = vpop.permute.xlu0 %1389 }
 0xdf0   :  { %v1392_v56 = vmul.f32 %v1390_v21, %v1387_v53  ;;  %v1749_v53 = vld [vmem:[#allocation6 + $0x70] sm:$0xff]  ;;  %v3948_v21 = vpack.c.bf16 %v1748_v52, %v1747_v50  ;;  %v2095_v52 = vld [vmem:[#allocation6 + $0x80] sm:$0xff] }
 0xdf2   :  { %v4497_v58 = vadd.f32 %v1393_v55, %v1392_v56  ;;  %v1750_v55 = vld [vmem:[#allocation6 + $0x78] sm:$0xff] }
 0xdf3   :  { %v1573_v54 = vpop.permute.xlu0 %1572  ;;  %v3951_v56 = vpack.c.bf16 %v1750_v55, %v1749_v53  ;;  %v2096_v53 = vld [vmem:[#allocation6 + $0x88] sm:$0xff] }
 0xdf4   :  { %1400 = vrot.lane.b32.xlu1 %v4497_v58, %s4212_s15  ;;  %v1575_v61 = vmul.f32 %v1573_v54, %v1553_v28  ;;  %v320_v28 = vrot.slane %v4314_v10, %v319_v16 }
 0xdf6   :  { %v4541_v34 = vadd.f32 %v4324_v17, %v320_v28 }
 0xe60   :  { %v1569_v60 = vpop.permute.xlu1 %1568 }
 0xe61   :  { %v1571_v51 = vmul.f32 %v1569_v60, %v1566_v59 }
 0xe63   :  { %v4501_v62 = vadd.f32 %v1575_v61, %v1571_v51 }
 0xe65   :  { %1578 = vrot.lane.b32.xlu0 %v4501_v62, %s4211_s14 }
 0xe66   :  { %v1401_v63 = vpop.permute.xlu1 %1400 }
 0xe67   :  { %3566 = vmatmul.mubr.msk.f32.vlgmr.msra.gmra.mrb[12].mxu0 %vm153_vm2, %v1401_v63  ;;  %3599 = vmatmul.mubr.msk.f32.vlgmr.msra.gmra.mrb[18].mxu1 %vm153_vm2, %v1401_v63 }
 0xe68   :  { %3937 = vmatpush3.bf16.msra.mxu0 %v4336_v31  ;;  %3955 = vmatpush3.bf16.msra.mxu1 %v4347_v40 }
 0xe69   :  { %3938 = vmatprep.subr.bf16.mxu0 %v4208_v0  ;;  %3956 = vmatprep.subr.bf16.mxu1 %v4208_v0 }
 0xe6a   :  { %3587 = vmatprep.mubr.msk.f32.mxu0 %vm4209_vm0, %v4210_v1  ;;  %3620 = vmatprep.mubr.msk.f32.mxu1 %vm4209_vm0, %v4210_v1 }
 0xe6c   :  { %3940 = vmatpush3.bf16.msra.mxu0 %v4339_v33  ;;  %3958 = vmatpush3.bf16.msra.mxu1 %v4354_v44 }
 0xe6d   :  { %3947 = vmatprep.subr.bf16.mxu0 %v4208_v0  ;;  %3965 = vmatprep.subr.bf16.mxu1 %v4208_v0 }
 0xed7   :  { %v1579_v30 = vpop.permute.xlu0 %1578 }
 0xed8   :  { %3588 = vmatmul.mubr.msk.f32.vlgmr.msra.gmra.mrb[14].mxu0 %vm153_vm2, %v1579_v30  ;;  %3621 = vmatmul.mubr.msk.f32.vlgmr.msra.gmra.mrb[20].mxu1 %vm153_vm2, %v1579_v30 }
 0xed9   :  { %3967 = vmatpush3.bf16.msra.mxu1 %v4383_v12  ;;  %3609 = vmatprep.mubr.msk.f32.mxu0 %vm4209_vm0, %v4210_v1 }
 0xeda   :  { %3968 = vmatprep.subr.bf16.mxu1 %v4208_v0  ;;  %3642 = vmatprep.mubr.msk.f32.mxu1 %vm4209_vm0, %v4210_v1 }
 0xedb   :  { %3949 = vmatpush3.bf16.msra.mxu0 %v3948_v21  ;;  %v3972_v21 = vpack.c.bf16 %v2096_v53, %v2095_v52 }
 0xedc   :  { %3950 = vmatprep.subr.bf16.mxu0 %v4208_v0 }
 0xedd   :  { %3970 = vmatpush3.bf16.msra.mxu1 %v4386_v15 }
 0xede   :  { %3977 = vmatprep.subr.bf16.mxu1 %v4208_v0 }
 0xedf   :  { %3952 = vmatpush3.bf16.msra.mxu0 %v3951_v56 }
 0xee0   :  { %3959 = vmatprep.subr.bf16.mxu0 %v4208_v0 }
 0xf3a   :  { %v1470_v2 = vpop.f32.mrb[12].mxu0  ;;  %v1718_v14 = vpop.f32.mrb[18].mxu1 }
 0xf3b   :  { %v4530_v3 = vadd.f32 %v1470_v2, %v4460_v32  ;;  %v1727_v4 = vadd.f32 %v1718_v14, %v4424_v43  ;;  %v3567_v5 = vpop.f32.mrb[13].mxu0  ;;  %v3600_v6 = vpop.f32.mrb[19].mxu1 }
 0xf3d   :  { %1729 = vrot.lane.b32.xlu1 %v1727_v4, %s4211_s14 }
 0xfab   :  { %v1648_v8 = vpop.f32.mrb[14].mxu0  ;;  %v1893_v9 = vpop.f32.mrb[20].mxu1 }
 0xfac   :  { %v1649_v11 = vadd.f32 %v4369_v45, %v1648_v8  ;;  %v1902_v13 = vadd.f32 %v1893_v9, %v4376_v57  ;;  %v3589_v18 = vpop.f32.mrb[15].mxu0  ;;  %v3622_v19 = vpop.f32.mrb[21].mxu1  ;;  %v1897_v35 = vadd.f32 %v1893_v9, %v4541_v34 }
 0xfae   :  { %v1722_v20 = vadd.f32 %v1718_v14, %v1649_v11  ;;  %1904 = vrot.lane.b32.xlu0 %v1902_v13, %s4211_s14  ;;  %v1898_v36 = vmul.f32 0.5, %v1897_v35 }
 0xfaf   :  { %v1730_v27 = vpop.permute.xlu1 %1729 }
 0xfb0   :  { %v1723_v22 = vmul.f32 0.5, %v1722_v20 }
 0xfb2   :  { %4092 = vtanh.f32 %v1723_v22 }
 0xfb3   :  { %4094 = vtanh.f32 %v1898_v36 }
 0xfbc   :  { %v4093_v32 = vpop.eup %4092 }
 0xfbd   :  { %v1725_v23 = vmul.f32 0.5, %v4093_v32  ;;  %v4095_v37 = vpop.eup %4094 }
 0xfbe   :  { %v1900_v38 = vmul.f32 0.5, %v4095_v37 }
 0xfbf   :  { %v1726_v26 = vadd.f32 0.5, %v1725_v23 }
 0xfc0   :  { %v1901_v39 = vadd.f32 0.5, %v1900_v38 }
 0xfc1   :  { %v1732_v29 = vmul.f32 %v1730_v27, %v1726_v26  ;;  %v1739_v59 = vsub.f32 1.0, %v1726_v26  ;;  %v1745_v61 = vmul.f32 %v1726_v26, %v4497_v58 }
 0xfc2   :  { %v1914_v30 = vsub.f32 1.0, %v1901_v39 }
 0xfc3   :  { %1734 = vrot.lane.b32.xlu1 %v1732_v29, %s4211_s14 }
0x1020   :  { %v1905_v41 = vpop.permute.xlu0 %1904 }
0x1021   :  { %v1907_v42 = vmul.f32 %v1905_v41, %v1901_v39 }
0x1023   :  { %1909 = vrot.lane.b32.xlu0 %v1907_v42, %s4211_s14 }
0x1035   :  { %v1735_v46 = vpop.permute.xlu1 %1734 }
0x1036   :  { %v1737_v47 = vadd.f32 %v1735_v46, %v1649_v11 }
0x1038   :  { %4096 = vtanh.f32 %v1737_v47 }
0x1042   :  { %v4097_v48 = vpop.eup %4096 }
0x1043   :  { %1741 = vrot.lane.b32.xlu1 %v4097_v48, %s4212_s15 }
0x1047   :  { %1920 = vrot.lane.b32.xlu1 %v4501_v62, %s4212_s15 }
0x1095   :  { %v1910_v17 = vpop.permute.xlu0 %1909 }
0x1096   :  { %v1912_v49 = vadd.f32 %v1910_v17, %v4541_v34 }
0x1098   :  { %4098 = vtanh.f32 %v1912_v49 }
0x10a2   :  { %v4099_v54 = vpop.eup %4098 }
0x10a3   :  { %1916 = vrot.lane.b32.xlu0 %v4099_v54, %s4212_s15 }
0x10b5   :  { %v1742_v60 = vpop.permute.xlu1 %1741 }
0x10b6   :  { %v1744_v51 = vmul.f32 %v1742_v60, %v1739_v59 }
0x10b8   :  { %v4553_v62 = vadd.f32 %v1745_v61, %v1744_v51  ;;  %v2097_v61 = vld [vmem:[#allocation6 + $0x90] sm:$0xff]  ;;  %v2098_v51 = vld [vmem:[#allocation6 + $0x98] sm:$0xff] }
0x10b9   :  { %v1921_v63 = vpop.permute.xlu1 %1920 }
0x10ba   :  { %1752 = vrot.lane.b32.xlu0 %v4553_v62, %s4212_s15  ;;  %v1923_v14 = vmul.f32 %v1921_v63, %v1901_v39  ;;  %v3975_v63 = vpack.c.bf16 %v2098_v51, %v2097_v61 }
0x1115   :  { %v1917_v2 = vpop.permute.xlu0 %1916 }
0x1116   :  { %v1919_v4 = vmul.f32 %v1917_v2, %v1914_v30 }
0x1118   :  { %v1924_v5 = vadd.f32 %v1923_v14, %v1919_v4 }
0x111a   :  { %1926 = vrot.lane.b32.xlu1 %v1924_v5, %s4212_s15 }
0x112c   :  { %v1753_v6 = vpop.permute.xlu0 %1752 }
0x112d   :  { %3610 = vmatmul.mubr.msk.f32.vlgmr.msra.gmra.mrb[16].mxu0 %vm153_vm2, %v1753_v6  ;;  %3643 = vmatmul.mubr.msk.f32.vlgmr.msra.gmra.mrb[22].mxu1 %vm153_vm2, %v1753_v6 }
0x112e   :  { %3961 = vmatpush3.bf16.msra.mxu0 %v4336_v31  ;;  %3979 = vmatpush3.bf16.msra.mxu1 %v4347_v40 }
0x112f   :  { %3962 = vmatprep.subr.bf16.mxu0 %v4208_v0  ;;  %3980 = vmatprep.subr.bf16.mxu1 %v4208_v0 }
0x1130   :  { %3631 = vmatprep.mubr.msk.f32.mxu0 %vm4209_vm0, %v4210_v1  ;;  %3664 = vmatprep.mubr.msk.f32.mxu1 %vm4209_vm0, %v4210_v1 }
0x1132   :  { %3964 = vmatpush3.bf16.msra.mxu0 %v4339_v33  ;;  %3982 = vmatpush3.bf16.msra.mxu1 %v4354_v44 }
0x1133   :  { %3971 = vmatprep.subr.bf16.mxu0 %v4208_v0  ;;  %3989 = vmatprep.subr.bf16.mxu1 %v4208_v0 }
0x118c   :  { %v4572_v58 = vpop.permute.xlu1 %1926 }
0x118d   :  { %3632 = vmatmul.mubr.msk.f32.vlgmr.msra.gmra.mrb[18].mxu0 %vm153_vm2, %v4572_v58  ;;  %3665 = vmatmul.mubr.msk.f32.vlgmr.msra.gmra.mrb[24].mxu1 %vm153_vm2, %v4572_v58 }
0x118e   :  { %3991 = vmatpush3.bf16.msra.mxu1 %v4383_v12  ;;  %3653 = vmatprep.mubr.msk.f32.mxu0 %vm4209_vm0, %v4210_v1 }
0x118f   :  { %3992 = vmatprep.subr.bf16.mxu1 %v4208_v0  ;;  %3686 = vmatprep.mubr.msk.f32.mxu1 %vm4209_vm0, %v4210_v1 }
0x1190   :  { %3973 = vmatpush3.bf16.msra.mxu0 %v3972_v21 }
0x1191   :  { %3974 = vmatprep.subr.bf16.mxu0 %v4208_v0 }
0x1192   :  { %3994 = vmatpush3.bf16.msra.mxu1 %v4386_v15 }
0x1193   :  { %4001 = vmatprep.subr.bf16.mxu1 %v4208_v0 }
0x1194   :  { %3976 = vmatpush3.bf16.msra.mxu0 %v3975_v63 }
0x1195   :  { %3983 = vmatprep.subr.bf16.mxu0 %v4208_v0 }
0x1200   :  { %v1822_v8 = vpop.f32.mrb[16].mxu0  ;;  %v2066_v9 = vpop.f32.mrb[22].mxu1 }
0x1201   :  { %v4587_v11 = vadd.f32 %v1822_v8, %v4530_v3  ;;  %v2075_v13 = vadd.f32 %v2066_v9, %v4424_v43  ;;  %v3611_v18 = vpop.f32.mrb[17].mxu0  ;;  %v3644_v19 = vpop.f32.mrb[23].mxu1 }
0x1203   :  { %2077 = vrot.lane.b32.xlu0 %v2075_v13, %s4211_s14 }
0x1260   :  { %v1996_v20 = vpop.f32.mrb[18].mxu0  ;;  %v2241_v22 = vpop.f32.mrb[24].mxu1 }
0x1261   :  { %v1997_v32 = vadd.f32 %v4369_v45, %v1996_v20  ;;  %v3633_v23 = vpop.f32.mrb[19].mxu0  ;;  %2246 = vrot.lane.b32.xlu1 %v2241_v22, %s4212_s15  ;;  %v3666_v26 = vpop.f32.mrb[25].mxu1  ;;  %v2259_v29 = vadd.f32 %v2241_v22, %v4376_v57 }
0x1263   :  { %v2070_v27 = vadd.f32 %v2066_v9, %v1997_v32 }
0x1265   :  { %v2071_v16 = vmul.f32 0.5, %v2070_v27  ;;  %2261 = vrot.lane.b32.xlu1 %v2259_v29, %s4213_s17 }
0x1267   :  { %4100 = vtanh.f32 %v2071_v16 }
0x1271   :  { %v4101_v3 = vpop.eup %4100 }
0x1272   :  { %v2073_v28 = vmul.f32 0.5, %v4101_v3 }
0x1274   :  { %v2074_v35 = vadd.f32 0.5, %v2073_v28 }
0x1275   :  { %v2078_v36 = vpop.permute.xlu0 %2077 }
0x1276   :  { %v2080_v37 = vmul.f32 %v2078_v36, %v2074_v35  ;;  %v2087_v2 = vsub.f32 1.0, %v2074_v35  ;;  %v2093_v4 = vmul.f32 %v2074_v35, %v4553_v62 }
0x1278   :  { %2082 = vrot.lane.b32.xlu0 %v2080_v37, %s4211_s14 }
0x12d3   :  { %v2247_v38 = vpop.permute.xlu1 %2246 }
0x12d4   :  { %v2249_v39 = vadd.f32 %v2247_v38, %v4541_v34  ;;  %v323_v34 = vsub.s32 4, %v4312_v7 }
0x12d6   :  { %v2251_v41 = vmul.f32 0.5, %v2249_v39  ;;  %v324_v56 = vrot.slane %v4314_v10, %v323_v34 }
0x12d7   :  { %v2262_v48 = vpop.permute.xlu1 %2261 }
0x12d8   :  { %4102 = vtanh.f32 %v2251_v41  ;;  %v4603_v54 = vadd.f32 %v4331_v24, %v324_v56 }
0x12da   :  { %v2250_v6 = vadd.f32 %v2247_v38, %v4603_v54 }
0x12dc   :  { %v2252_v8 = vmul.f32 0.5, %v2250_v6 }
0x12e2   :  { %v4103_v42 = vpop.eup %4102 }
0x12e3   :  { %v2255_v46 = vmul.f32 0.5, %v4103_v42 }
0x12e5   :  { %v2257_v47 = vadd.f32 0.5, %v2255_v46 }
0x12e7   :  { %v2264_v17 = vmul.f32 %v2262_v48, %v2257_v47 }
0x12e9   :  { %2266 = vrot.lane.b32.xlu0 %v2264_v17, %s4211_s14 }
0x12ea   :  { %v2083_v49 = vpop.permute.xlu0 %2082 }
0x12eb   :  { %v2085_v50 = vadd.f32 %v2083_v49, %v1997_v32 }
0x12ed   :  { %4104 = vtanh.f32 %v2085_v50 }
0x12f7   :  { %v4105_v55 = vpop.eup %4104 }
0x12f8   :  { %2089 = vrot.lane.b32.xlu1 %v4105_v55, %s4212_s15 }
0x135b   :  { %v2267_v59 = vpop.permute.xlu0 %2266 }
0x135c   :  { %v2269_v60 = vadd.f32 %v2267_v59, %v4603_v54 }
0x135e   :  { %4106 = vtanh.f32 %v2269_v60  ;;  %v327_v60 = vsub.s32 5, %v4312_v7 }
0x135f   :  { %4108 = vtanh.f32 %v2252_v8 }
0x1368   :  { %v4107_v30 = vpop.eup %4106 }
0x1369   :  { %2273 = vrot.lane.b32.xlu1 %v4107_v30, %s4212_s15  ;;  %v4109_v9 = vpop.eup %4108  ;;  %v2448_v30 = vld [vmem:[#allocation6 + $0xa0] sm:$0xff] }
0x136a   :  { %v2090_v14 = vpop.permute.xlu1 %2089  ;;  %v2256_v13 = vmul.f32 0.5, %v4109_v9 }
0x136b   :  { %v2092_v5 = vmul.f32 %v2090_v14, %v2087_v2  ;;  %v2449_v2 = vld [vmem:[#allocation6 + $0xa8] sm:$0xff]  ;;  %v2450_v14 = vld [vmem:[#allocation6 + $0xb0] sm:$0xff] }
0x136c   :  { %v2258_v18 = vadd.f32 0.5, %v2256_v13 }
0x136d   :  { %v4609_v24 = vadd.f32 %v2093_v4, %v2092_v5  ;;  %v3996_v4 = vpack.c.bf16 %v2449_v2, %v2448_v30  ;;  %v2451_v5 = vld [vmem:[#allocation6 + $0xb8] sm:$0xff] }
0x136e   :  { %v2271_v22 = vsub.f32 1.0, %v2258_v18  ;;  %v2278_v32 = vmul.f32 %v2258_v18, %v4572_v58  ;;  %v3999_v6 = vpack.c.bf16 %v2451_v5, %v2450_v14 }
0x136f   :  { %2100 = vrot.lane.b32.xlu0 %v4609_v24, %s4212_s15 }
0x13db   :  { %v2274_v19 = vpop.permute.xlu1 %2273 }
0x13dc   :  { %v2276_v62 = vmul.f32 %v2274_v19, %v2271_v22 }
0x13de   :  { %v2279_v23 = vadd.f32 %v2278_v32, %v2276_v62 }
0x13e1   :  { %v2101_v20 = vpop.permute.xlu0 %2100 }
0x13e2   :  { %3654 = vmatmul.mubr.msk.f32.vlgmr.msra.gmra.mrb[20].mxu0 %vm153_vm2, %v2101_v20  ;;  %3687 = vmatmul.mubr.msk.f32.vlgmr.msra.gmra.mrb[26].mxu1 %vm153_vm2, %v2101_v20 }
0x13e3   :  { %3985 = vmatpush3.bf16.msra.mxu0 %v4336_v31  ;;  %4003 = vmatpush3.bf16.msra.mxu1 %v4347_v40 }
0x13e4   :  { %3986 = vmatprep.subr.bf16.mxu0 %v4208_v0  ;;  %4004 = vmatprep.subr.bf16.mxu1 %v4208_v0 }
0x13e5   :  { %3675 = vmatprep.mubr.msk.f32.mxu0 %vm4209_vm0, %v4210_v1  ;;  %3708 = vmatprep.mubr.msk.f32.mxu1 %vm4209_vm0, %v4210_v1 }
0x13e7   :  { %3988 = vmatpush3.bf16.msra.mxu0 %v4339_v33  ;;  %4006 = vmatpush3.bf16.msra.mxu1 %v4354_v44 }
0x13e8   :  { %3995 = vmatprep.subr.bf16.mxu0 %v4208_v0  ;;  %4013 = vmatprep.subr.bf16.mxu1 %v4208_v0 }
0x13ea   :  { %3676 = vmatmul.mubr.msk.f32.vlgmr.msra.gmra.mrb[22].mxu0 %vm153_vm2, %v2279_v23  ;;  %3709 = vmatmul.mubr.msk.f32.vlgmr.msra.gmra.mrb[28].mxu1 %vm153_vm2, %v2279_v23 }
0x13eb   :  { %4015 = vmatpush3.bf16.msra.mxu1 %v4383_v12  ;;  %3697 = vmatprep.mubr.msk.f32.mxu0 %vm4209_vm0, %v4210_v1 }
0x13ec   :  { %4016 = vmatprep.subr.bf16.mxu1 %v4208_v0  ;;  %3730 = vmatprep.mubr.msk.f32.mxu1 %vm4209_vm0, %v4210_v1 }
0x13ed   :  { %3997 = vmatpush3.bf16.msra.mxu0 %v3996_v4 }
0x13ee   :  { %3998 = vmatprep.subr.bf16.mxu0 %v4208_v0 }
0x13ef   :  { %4018 = vmatpush3.bf16.msra.mxu1 %v4386_v15 }
0x13f0   :  { %4025 = vmatprep.subr.bf16.mxu1 %v4208_v0 }
0x13f1   :  { %4000 = vmatpush3.bf16.msra.mxu0 %v3999_v6 }
0x13f2   :  { %4007 = vmatprep.subr.bf16.mxu0 %v4208_v0 }
0x14b5   :  { %v2170_v58 = vpop.f32.mrb[20].mxu0  ;;  %v2419_v26 = vpop.f32.mrb[26].mxu1 }
0x14b6   :  { %v4640_v27 = vadd.f32 %v2170_v58, %v4587_v11  ;;  %v2428_v29 = vadd.f32 %v2419_v26, %v4424_v43  ;;  %v3655_v16 = vpop.f32.mrb[21].mxu0  ;;  %v3688_v3 = vpop.f32.mrb[27].mxu1 }
0x14b8   :  { %2430 = vrot.lane.b32.xlu0 %v2428_v29, %s4211_s14 }
0x14bd   :  { %v2349_v28 = vpop.f32.mrb[22].mxu0  ;;  %v2594_v35 = vpop.f32.mrb[28].mxu1 }
0x14be   :  { %v3677_v36 = vpop.f32.mrb[23].mxu0  ;;  %2599 = vrot.lane.b32.xlu1 %v2594_v35, %s4211_s14  ;;  %v3710_v37 = vpop.f32.mrb[29].mxu1  ;;  %v2350_v38 = vadd.f32 %v4369_v45, %v2349_v28  ;;  %v2607_v21 = vadd.f32 %v2594_v35, %v4376_v57 }
0x14c0   :  { %v2423_v39 = vadd.f32 %v2419_v26, %v2350_v38 }
0x14c2   :  { %v2424_v41 = vmul.f32 0.5, %v2423_v39 }
0x14c4   :  { %4110 = vtanh.f32 %v2424_v41 }
0x14ce   :  { %v4111_v42 = vpop.eup %4110 }
0x14cf   :  { %v2426_v11 = vmul.f32 0.5, %v4111_v42 }
0x14d1   :  { %v2427_v46 = vadd.f32 0.5, %v2426_v11 }
0x14d3   :  { %v2446_v8 = vmul.f32 %v2427_v46, %v4609_v24 }
0x152a   :  { %v2431_v47 = vpop.permute.xlu0 %2430 }
0x152b   :  { %v2433_v48 = vmul.f32 %v2431_v47, %v2427_v46 }
0x152d   :  { %2435 = vrot.lane.b32.xlu0 %v2433_v48, %s4211_s14 }
0x1530   :  { %v2600_v17 = vpop.permute.xlu1 %2599 }
0x1531   :  { %v2602_v49 = vadd.f32 %v2600_v17, %v4603_v54  ;;  %v328_v54 = vrot.slane %v4314_v10, %v327_v60  ;;  %v2440_v10 = vsub.f32 1.0, %v2427_v46  ;;  %v2797_v60 = vld [vmem:[#allocation6 + $0xc8] sm:$0xff] }
0x1533   :  { %v2603_v50 = vmul.f32 0.5, %v2602_v49  ;;  %v4655_v61 = vadd.f32 %v4333_v25, %v328_v54  ;;  %v2798_v54 = vld [vmem:[#allocation6 + $0xd0] sm:$0xff] }
0x1535   :  { %4112 = vtanh.f32 %v2603_v50 }
0x153f   :  { %v4113_v52 = vpop.eup %4112 }
0x1540   :  { %v2605_v53 = vmul.f32 0.5, %v4113_v52 }
0x1542   :  { %v2606_v45 = vadd.f32 0.5, %v2605_v53 }
0x1544   :  { %v2608_v55 = vmul.f32 %v2607_v21, %v2606_v45  ;;  %v2615_v19 = vsub.f32 1.0, %v2606_v45 }
0x1546   :  { %2610 = vrot.lane.b32.xlu1 %v2608_v55, %s4211_s14 }
0x159f   :  { %v2436_v34 = vpop.permute.xlu0 %2435 }
0x15a0   :  { %v2438_v56 = vadd.f32 %v2436_v34, %v2350_v38 }
0x15a2   :  { %4114 = vtanh.f32 %v2438_v56 }
0x15ac   :  { %v4115_v59 = vpop.eup %4114 }
0x15ad   :  { %2442 = vrot.lane.b32.xlu0 %v4115_v59, %s4212_s15  ;;  %v2796_v59 = vld [vmem:[#allocation6 + $0xc0] sm:$0xff] }
0x15b1   :  { %2621 = vrot.lane.b32.xlu0 %v2279_v23, %s4212_s15 }
0x15b8   :  { %v2611_v51 = vpop.permute.xlu1 %2610 }
0x15b9   :  { %v2613_v63 = vadd.f32 %v2611_v51, %v4655_v61  ;;  %v4020_v51 = vpack.c.bf16 %v2797_v60, %v2796_v59 }
0x15bb   :  { %4116 = vtanh.f32 %v2613_v63  ;;  %v2799_v63 = vld [vmem:[#allocation6 + $0xd8] sm:$0xff] }
0x15bc   :  { %v4023_v30 = vpack.c.bf16 %v2799_v63, %v2798_v54 }
0x15c5   :  { %v4117_v7 = vpop.eup %4116 }
0x15c6   :  { %2617 = vrot.lane.b32.xlu1 %v4117_v7, %s4212_s15 }
0x161f   :  { %v2443_v25 = vpop.permute.xlu0 %2442 }
0x1620   :  { %v2445_v9 = vmul.f32 %v2443_v25, %v2440_v10 }
0x1622   :  { %v4662_v13 = vadd.f32 %v2446_v8, %v2445_v9 }
0x1623   :  { %v2622_v18 = vpop.permute.xlu0 %2621 }
0x1624   :  { %2453 = vrot.lane.b32.xlu1 %v4662_v13, %s4212_s15  ;;  %v2624_v22 = vmul.f32 %v2622_v18, %v2606_v45 }
0x1638   :  { %v2618_v20 = vpop.permute.xlu1 %2617 }
0x1639   :  { %v2620_v62 = vmul.f32 %v2618_v20, %v2615_v19 }
0x163b   :  { %v2625_v32 = vadd.f32 %v2624_v22, %v2620_v62 }
0x163d   :  { %2627 = vrot.lane.b32.xlu0 %v2625_v32, %s4213_s17 }
0x1696   :  { %v2454_v23 = vpop.permute.xlu1 %2453 }
0x1697   :  { %3698 = vmatmul.mubr.msk.f32.vlgmr.msra.gmra.mrb[24].mxu0 %vm153_vm2, %v2454_v23  ;;  %3731 = vmatmul.mubr.msk.f32.vlgmr.msra.gmra.mrb[30].mxu1 %vm153_vm2, %v2454_v23 }
0x1698   :  { %4009 = vmatpush3.bf16.msra.mxu0 %v4336_v31  ;;  %4027 = vmatpush3.bf16.msra.mxu1 %v4347_v40 }
0x1699   :  { %4010 = vmatprep.subr.bf16.mxu0 %v4208_v0  ;;  %4028 = vmatprep.subr.bf16.mxu1 %v4208_v0 }
0x169a   :  { %3719 = vmatprep.mubr.msk.f32.mxu0 %vm4209_vm0, %v4210_v1  ;;  %3752 = vmatprep.mubr.msk.f32.mxu1 %vm4209_vm0, %v4210_v1 }
0x169c   :  { %4012 = vmatpush3.bf16.msra.mxu0 %v4339_v33  ;;  %4030 = vmatpush3.bf16.msra.mxu1 %v4354_v44 }
0x169d   :  { %4019 = vmatprep.subr.bf16.mxu0 %v4208_v0  ;;  %4037 = vmatprep.subr.bf16.mxu1 %v4208_v0 }
0x16af   :  { %v2628_v24 = vpop.permute.xlu0 %2627 }
0x16b0   :  { %3720 = vmatmul.mubr.msk.f32.vlgmr.msra.gmra.mrb[26].mxu0 %vm153_vm2, %v2628_v24  ;;  %3753 = vmatmul.mubr.msk.f32.vlgmr.msra.gmra.mrb[32].mxu1 %vm153_vm2, %v2628_v24 }
0x16b1   :  { %4039 = vmatpush3.bf16.msra.mxu1 %v4383_v12  ;;  %3741 = vmatprep.mubr.msk.f32.mxu0 %vm4209_vm0, %v4210_v1 }
0x16b2   :  { %4040 = vmatprep.subr.bf16.mxu1 %v4208_v0  ;;  %3774 = vmatprep.mubr.msk.f32.mxu1 %vm4209_vm0, %v4210_v1 }
0x16b3   :  { %4021 = vmatpush3.bf16.msra.mxu0 %v4020_v51 }
0x16b4   :  { %4022 = vmatprep.subr.bf16.mxu0 %v4208_v0 }
0x16b5   :  { %4042 = vmatpush3.bf16.msra.mxu1 %v4386_v15  ;;  %v4698_v15 = vld [vmem:[#allocation2 + $0x88] ss:$0 sm:$0xff] }
0x16b7   :  { %4024 = vmatpush3.bf16.msra.mxu0 %v4023_v30 }
0x16b8   :  { %4031 = vmatprep.subr.bf16.mxu0 %v4208_v0 }
0x176a   :  { %v2523_v40 = vpop.f32.mrb[24].mxu0  ;;  %v2767_v44 = vpop.f32.mrb[30].mxu1 }
0x176b   :  { %v4691_v58 = vadd.f32 %v2523_v40, %v4640_v27  ;;  %v2776_v26 = vadd.f32 %v2767_v44, %v4424_v43  ;;  %v3699_v29 = vpop.f32.mrb[25].mxu0  ;;  %v3732_v16 = vpop.f32.mrb[31].mxu1 }
0x176d   :  { %2778 = vrot.lane.b32.xlu1 %v2776_v26, %s4211_s14 }
0x1783   :  { %v2697_v12 = vpop.f32.mrb[26].mxu0  ;;  %v2942_v3 = vpop.f32.mrb[32].mxu1 }
0x1784   :  { %v2955_v28 = vadd.f32 %v2942_v3, %v4376_v57  ;;  %v3721_v35 = vpop.f32.mrb[27].mxu0  ;;  %2947 = vrot.lane.b32.xlu0 %v2942_v3, %s4213_s17  ;;  %v3754_v36 = vpop.f32.mrb[33].mxu1  ;;  %v2698_v27 = vadd.f32 %v4698_v15, %v2697_v12 }
0x1785   :  { %v3149_v35 = vld [vmem:[#allocation6 + $0xe8] sm:$0xff]  ;;  %v3150_v36 = vld [vmem:[#allocation6 + $0xf0] sm:$0xff] }
0x1786   :  { %2957 = vrot.lane.b32.xlu1 %v2955_v28, %s4212_s15  ;;  %v2771_v37 = vadd.f32 %v2767_v44, %v2698_v27  ;;  %v3148_v28 = vld [vmem:[#allocation6 + $0xe0] sm:$0xff] }
0x1788   :  { %v2772_v38 = vmul.f32 0.5, %v2771_v37  ;;  %v3151_v37 = vld [vmem:[#allocation6 + $0xf8] sm:$0xff] }
0x178a   :  { %4118 = vtanh.f32 %v2772_v38 }
0x1794   :  { %v4119_v39 = vpop.eup %4118 }
0x1795   :  { %v2774_v41 = vmul.f32 0.5, %v4119_v39 }
0x1797   :  { %v2775_v42 = vadd.f32 0.5, %v2774_v41 }
0x1799   :  { %v2788_v14 = vsub.f32 1.0, %v2775_v42 }
0x17df   :  { %v2779_v11 = vpop.permute.xlu1 %2778 }
0x17e0   :  { %v2781_v46 = vmul.f32 %v2779_v11, %v2775_v42 }
0x17e2   :  { %2783 = vrot.lane.b32.xlu0 %v2781_v46, %s4211_s14 }
0x17f6   :  { %v2948_v57 = vpop.permute.xlu0 %2947 }
0x17f7   :  { %v2950_v47 = vadd.f32 %v2948_v57, %v4655_v61 }
0x17f8   :  { %v2958_v52 = vpop.permute.xlu1 %2957 }
0x17f9   :  { %v2951_v48 = vmul.f32 0.5, %v2950_v47 }
0x17fb   :  { %4120 = vtanh.f32 %v2951_v48  ;;  %v3281_v48 = vld [vmem:[#allocation6 + $0x100] ss:$0 sm:$0xff] }
0x1805   :  { %v4121_v17 = vpop.eup %4120 }
0x1806   :  { %v2953_v49 = vmul.f32 0.5, %v4121_v17 }
0x1808   :  { %v2954_v50 = vadd.f32 0.5, %v2953_v49 }
0x180a   :  { %v2960_v53 = vmul.f32 %v2958_v52, %v2954_v50  ;;  %v2967_v10 = vsub.f32 1.0, %v2954_v50 }
0x180c   :  { %2962 = vrot.lane.b32.xlu1 %v2960_v53, %s4211_s14 }
0x1854   :  { %v2784_v21 = vpop.permute.xlu0 %2783 }
0x1855   :  { %v2786_v45 = vadd.f32 %v2784_v21, %v2698_v27  ;;  %v4044_v27 = vpack.c.bf16 %v3149_v35, %v3148_v28 }
0x1857   :  { %4122 = vtanh.f32 %v2786_v45 }
0x1861   :  { %v4123_v55 = vpop.eup %4122 }
0x1862   :  { %2790 = vrot.lane.b32.xlu0 %v4123_v55, %s4212_s15 }
0x1866   :  { %2973 = vrot.lane.b32.xlu0 %v2625_v32, %s4212_s15 }
0x187e   :  { %v2963_v34 = vpop.permute.xlu1 %2962 }
0x187f   :  { %v2965_v56 = vadd.f32 %v2963_v34, %v4655_v61  ;;  %v2794_v61 = vmul.f32 %v2775_v42, %v4662_v13 }
0x1881   :  { %4124 = vtanh.f32 %v2965_v56 }
0x188b   :  { %v4125_v2 = vpop.eup %4124 }
0x188c   :  { %2969 = vrot.lane.b32.xlu1 %v4125_v2, %s4212_s15 }
0x18d4   :  { %v2791_v4 = vpop.permute.xlu0 %2790 }
0x18d5   :  { %v2793_v5 = vmul.f32 %v2791_v4, %v2788_v14 }
0x18d7   :  { %v2795_v6 = vadd.f32 %v2794_v61, %v2793_v5 }
0x18d8   :  { %v2974_v7 = vpop.permute.xlu0 %2973 }
0x18d9   :  { %2801 = vrot.lane.b32.xlu1 %v2795_v6, %s4212_s15  ;;  %v2976_v8 = vmul.f32 %v2974_v7, %v2954_v50 }
0x18fe   :  { %v2970_v25 = vpop.permute.xlu1 %2969 }
0x18ff   :  { %v2972_v9 = vmul.f32 %v2970_v25, %v2967_v10 }
0x1901   :  { %v2977_v18 = vadd.f32 %v2976_v8, %v2972_v9 }
0x1903   :  { %2979 = vrot.lane.b32.xlu0 %v2977_v18, %s4211_s14 }
0x194b   :  { %v2802_v19 = vpop.permute.xlu1 %2801 }
0x194c   :  { %3742 = vmatmul.mubr.msk.f32.vlgmr.msra.gmra.mrb[28].mxu0 %vm153_vm2, %v2802_v19  ;;  %3775 = vmatmul.mubr.msk.f32.vlgmr.msra.gmra.mrb[34].mxu1 %vm153_vm2, %v2802_v19 }
0x194d   :  { %4033 = vmatpush3.bf16.msra.mxu0 %v4336_v31  ;;  %3763 = vmatprep.mubr.msk.f32.mxu0 %vm4209_vm0, %v4210_v1 }
0x194e   :  { %4034 = vmatprep.subr.bf16.mxu0 %v4208_v0 }
0x1951   :  { %4036 = vmatpush3.bf16.msra.mxu0 %v4339_v33 }
0x1952   :  { %4043 = vmatprep.subr.bf16.mxu0 %v4208_v0 }
0x1975   :  { %v2980_v13 = vpop.permute.xlu0 %2979 }
0x1976   :  { %3764 = vmatmul.mubr.msk.f32.vlgmr.msra.gmra.mrb[30].mxu0 %vm153_vm2, %v2980_v13 }
0x1977   :  { %3785 = vmatprep.mubr.msk.f32.mxu0 %vm4209_vm0, %v4210_v1  ;;  %4045 = vmatpush3.bf16.msra.mxu0 %v4044_v27 }
0x1978   :  { %4046 = vmatprep.subr.bf16.mxu0 %v4208_v0 }
0x1a1f   :  { %v2871_v20 = vpop.f32.mrb[28].mxu0  ;;  %v3119_v22 = vpop.f32.mrb[34].mxu1 }
0x1a20   :  { %v2875_v62 = vadd.f32 %v2871_v20, %v4691_v58  ;;  %v3128_v31 = vadd.f32 %v3119_v22, %v4424_v43  ;;  %v3743_v32 = vpop.f32.mrb[29].mxu0  ;;  %v3776_v23 = vpop.f32.mrb[35].mxu1 }
0x1a22   :  { %3130 = vrot.lane.b32.xlu1 %v3128_v31, %s4211_s14 }
0x1a49   :  { %v3049_v24 = vpop.f32.mrb[30].mxu0 }
0x1a4a   :  { %v3765_v33 = vpop.f32.mrb[31].mxu0  ;;  %v3050_v40 = vadd.f32 %v4698_v15, %v3049_v24  ;;  %v4047_v15 = vpack.c.bf16 %v3151_v37, %v3150_v36 }
0x1a4c   :  { %v3123_v44 = vadd.f32 %v3119_v22, %v3050_v40  ;;  %4048 = vmatpush3.bf16.msra.mxu0 %v4047_v15 }
0x1a4e   :  { %v3124_v26 = vmul.f32 0.5, %v3123_v44 }
0x1a50   :  { %4126 = vtanh.f32 %v3124_v26 }
0x1a5a   :  { %v4127_v29 = vpop.eup %4126 }
0x1a5b   :  { %v3126_v16 = vmul.f32 0.5, %v4127_v29 }
0x1a5d   :  { %v3127_v1 = vadd.f32 0.5, %v3126_v16 }
0x1a5f   :  { %v3140_v39 = vsub.f32 1.0, %v3127_v1  ;;  %v3146_v42 = vmul.f32 %v3127_v1, %v2795_v6 }
0x1a94   :  { %v3131_v12 = vpop.permute.xlu1 %3130 }
0x1a95   :  { %v3133_v3 = vmul.f32 %v3131_v12, %v3127_v1 }
0x1a97   :  { %3135 = vrot.lane.b32.xlu0 %v3133_v3, %s4211_s14 }
0x1b09   :  { %v3136_v58 = vpop.permute.xlu0 %3135 }
0x1b0a   :  { %v3138_v43 = vadd.f32 %v3136_v58, %v3050_v40 }
0x1b0c   :  { %4128 = vtanh.f32 %v3138_v43 }
0x1b16   :  { %v4129_v38 = vpop.eup %4128 }
0x1b17   :  { %3142 = vrot.lane.b32.xlu1 %v4129_v38, %s4212_s15 }
0x1b89   :  { %v3143_v41 = vpop.permute.xlu1 %3142 }
0x1b8a   :  { %v3145_v11 = vmul.f32 %v3143_v41, %v3140_v39 }
0x1b8c   :  { %v3147_v46 = vadd.f32 %v3146_v42, %v3145_v11 }
0x1b8e   :  { %3153 = vrot.lane.b32.xlu0 %v3147_v46, %s4212_s15 }
0x1c00   :  { %v3154_v57 = vpop.permute.xlu0 %3153 }
0x1c01   :  { %3786 = vmatmul.mubr.msk.f32.vlgmr.msra.gmra.mrb[32].mxu0 %vm153_vm2, %v3154_v57 }
0x1cd4   :  { %v3223_v47 = vpop.f32.mrb[32].mxu0 }
0x1cd5   :  { %v3227_v17 = vadd.f32 %v3223_v47, %v2875_v62  ;;  %v3787_v49 = vpop.f32.mrb[33].mxu0 }
0x1cd7   :  { %v3233_v50 = vadd.f32 %v3281_v48, %v3227_v17 }
0x1cd9   :  { %3234 = vst [vmem:[%s4741_s5] sm:$0x3] %v3233_v50 }
0x1cda   :  { %3239 = vsyncpa [#allocation3], 1 }
0x1cdb   :  { %3240 = vsyncpa [#allocation5], 1 }

</bundles_post_ra>
